<compile_context>
chip_gen: v6e
topology: v6e:2x2x1
jax: 0.10.0
libtpu: 0.0.40
codegen_flags: <defaults>
</compile_context>

<pallas_src>
import functools

import jax
import jax.numpy as jnp
import numpy as np
from jax.experimental import pallas as pl
from jax.experimental.pallas import tpu as pltpu

# ---------------------------------------------------------------------------
# Model configuration (small shapes consistent with the module's forward)
# ---------------------------------------------------------------------------
INPUTS = 4       # LSTM input feature size
OUTPUTS = 4      # Linear output size
H_SIZE = 32      # LSTM hidden size      (4*H = 128 -> lane aligned)
SEQ = 8          # sequence length
BATCH = 8        # batch size            (sublane aligned)
LAYERS = 3       # num LSTM layers
OUT_PAD = 128    # lane-padded FC output width (wrapper slices [:OUTPUTS])
F_PAD = 8        # sublane-padded input feature size

# Packed parameter buffer layout (all segments are 128 lanes wide, 8-aligned
# sublane offsets so in-kernel static slices hit vreg-tile boundaries).
R_WIH0, R_WHH0, R_B0 = 0, 8, 40
R_WIH1, R_WHH1, R_B1 = 48, 80, 112
R_WIH2, R_WHH2, R_B2 = 120, 152, 184
R_FCW, R_FCB, R_SCL = 192, 224, 232
P_ROWS = 240


# ---------------------------------------------------------------------------
# Pallas kernel: entire 3-layer LSTM recurrence + final FC in one invocation
# ---------------------------------------------------------------------------
def _lstm_kernel(x_ref,        # (T*B, F_PAD)   time-major, flattened, padded
                 p_ref,        # (P_ROWS, 128)  packed weights/biases/scale
                 out_ref,      # (B, OUT_PAD)
                 xproj_ref,    # VMEM scratch (T*B, 4H)
                 *, hidden, batch, seq):
    H, B, T = hidden, batch, seq
    G = 4 * H

    # ---- hoisted parameter slices (static, sublane-aligned) ----------------
    wih0 = p_ref[R_WIH0:R_WIH0 + F_PAD, :]        # (F_PAD, 4H), pad rows zero
    whh0 = p_ref[R_WHH0:R_WHH0 + H, :]            # (H, 4H)
    wih1 = p_ref[R_WIH1:R_WIH1 + H, :]
    whh1 = p_ref[R_WHH1:R_WHH1 + H, :]
    wih2 = p_ref[R_WIH2:R_WIH2 + H, :]
    whh2 = p_ref[R_WHH2:R_WHH2 + H, :]
    # Hoist bias / scale broadcasts once (JAX does not CSE broadcast_in_dim).
    b1 = jnp.broadcast_to(p_ref[R_B1:R_B1 + 1, :], (B, G))
    b2 = jnp.broadcast_to(p_ref[R_B2:R_B2 + 1, :], (B, G))
    scale = jnp.broadcast_to(p_ref[R_SCL:R_SCL + 1, :], (B, G))  # 0.5|1.0|0.5

    # ---- layer-0 input projection for ALL time steps in one matmul ---------
    # Stored to VMEM scratch (one unmasked full store) and reloaded per step,
    # keeping the live vreg set small through the skewed unrolled loop.
    xproj_ref[...] = (jnp.dot(x_ref[...], wih0,
                              preferred_element_type=jnp.float32)
                      + p_ref[R_B0:R_B0 + 1, :])

    def cell(gates, c_prev):
        # Single full-vreg tanh covers all gates:
        #   sigmoid(x) = 0.5*tanh(0.5*x) + 0.5   (i/f/o pre-scaled by 0.5)
        t = jnp.tanh(gates * scale)
        s = 0.5 * t + 0.5
        i = s[:, 0 * H:1 * H]
        f = s[:, 1 * H:2 * H]
        g = t[:, 2 * H:3 * H]
        o = s[:, 3 * H:4 * H]
        c_new = f * c_prev + i * g
        h_new = o * jnp.tanh(c_new)
        return h_new, c_new

    zeros = jnp.zeros((B, H), jnp.float32)
    h0 = h1 = h2 = zeros
    c0 = c1 = c2 = zeros

    # ---- skewed wavefront over the recurrence -------------------------------
    # At wavefront step w: layer0(t=w), layer1(t=w-1), layer2(t=w-2).
    # All three depend only on step w-1 results, so their MXU/EUP chains are
    # independent and overlap.  Loop is statically unrolled (T small/static).
    for w in range(T + 2):
        t0, t1, t2 = w, w - 1, w - 2
        if t0 < T:
            xp = xproj_ref[t0 * B:(t0 + 1) * B, :]
            g0 = xp if t0 == 0 else xp + jnp.dot(
                h0, whh0, preferred_element_type=jnp.float32)
            nh0, nc0 = cell(g0, c0)
        if 0 <= t1 < T:
            g1 = jnp.dot(h0, wih1, preferred_element_type=jnp.float32) + b1
            if t1 > 0:
                g1 = g1 + jnp.dot(h1, whh1, preferred_element_type=jnp.float32)
            nh1, nc1 = cell(g1, c1)
        if 0 <= t2 < T:
            g2 = jnp.dot(h1, wih2, preferred_element_type=jnp.float32) + b2
            if t2 > 0:
                g2 = g2 + jnp.dot(h2, whh2, preferred_element_type=jnp.float32)
            nh2, nc2 = cell(g2, c2)
        # Commit wavefront results (the reads above used pre-update values).
        if t0 < T:
            h0, c0 = nh0, nc0
        if 0 <= t1 < T:
            h1, c1 = nh1, nc1
        if 0 <= t2 < T:
            h2, c2 = nh2, nc2

    # ---- final FC on last-step top-layer hidden; lane-dense (8,128) store --
    out_ref[...] = (jnp.dot(h2, p_ref[R_FCW:R_FCW + H, :],
                            preferred_element_type=jnp.float32)
                    + p_ref[R_FCB:R_FCB + 1, :])


# ---------------------------------------------------------------------------
# Wrapper
# ---------------------------------------------------------------------------
def lstm_forward(x, params_packed):
    """x: (B, T, F) float32 (batch_first, like PyTorch). Returns (B, OUTPUTS)."""
    B, T, F = x.shape
    H = H_SIZE

    # time-major, flattened over (T, B); pad features to F_PAD (zeros).
    x_tm = jnp.transpose(x, (1, 0, 2)).reshape(T * B, F)
    x_pad = jnp.pad(x_tm, ((0, 0), (0, F_PAD - F)))

    kernel = functools.partial(_lstm_kernel, hidden=H, batch=B, seq=T)
    vmem = pl.BlockSpec(memory_space=pltpu.MemorySpace.VMEM)

    out = pl.pallas_call(
        kernel,
        out_shape=jax.ShapeDtypeStruct((B, OUT_PAD), jnp.float32),
        in_specs=[vmem, vmem],
        out_specs=vmem,
        scratch_shapes=[
            pltpu.VMEM((T * B, 4 * H), jnp.float32),   # x_proj spill
        ],
    )(x_pad, params_packed)

    # Slice off lane padding. PyTorch forward returns float64; with JAX x64
    # disabled (default) the cast is a no-op keeping float32.
    # TODO(synk): exact float64 output requires jax_enable_x64 (emulated/slow on TPU).
    return out[:, :OUTPUTS].astype(jnp.float64)


# ---------------------------------------------------------------------------
# Deterministic parameter init (PyTorch shapes: W_ih (4H,in), W_hh (4H,H),
# b_ih (4H,), b_hh (4H,), fc.weight (out,H), fc.bias (out,))
# ---------------------------------------------------------------------------
def init_raw_params(key):
    k = 1.0 / np.sqrt(H_SIZE)
    keys = jax.random.split(key, 14)
    ki = iter(keys)

    def u(shape):
        return jax.random.uniform(next(ki), shape, jnp.float32, minval=-k, maxval=k)

    in_sizes = [INPUTS, H_SIZE, H_SIZE]
    layers = []
    for layer in range(LAYERS):
        layers.append((u((4 * H_SIZE, in_sizes[layer])),   # W_ih
                       u((4 * H_SIZE, H_SIZE)),            # W_hh
                       u((4 * H_SIZE,)),                   # b_ih
                       u((4 * H_SIZE,))))                  # b_hh
    fc_w = u((OUTPUTS, H_SIZE))
    fc_b = u((OUTPUTS,))
    return layers, fc_w, fc_b


def pack_params(raw):
    """Pack everything into one (P_ROWS, 128) f32 buffer (single DMA)."""
    layers, fc_w, fc_b = raw
    G = 4 * H_SIZE
    p = np.zeros((P_ROWS, G), np.float32)

    (wih0, whh0, bi0, bh0), (wih1, whh1, bi1, bh1), (wih2, whh2, bi2, bh2) = layers
    p[R_WIH0:R_WIH0 + INPUTS] = np.asarray(wih0).T        # (F, 4H)
    p[R_WHH0:R_WHH0 + H_SIZE] = np.asarray(whh0).T
    p[R_B0] = np.asarray(bi0) + np.asarray(bh0)
    p[R_WIH1:R_WIH1 + H_SIZE] = np.asarray(wih1).T
    p[R_WHH1:R_WHH1 + H_SIZE] = np.asarray(whh1).T
    p[R_B1] = np.asarray(bi1) + np.asarray(bh1)
    p[R_WIH2:R_WIH2 + H_SIZE] = np.asarray(wih2).T
    p[R_WHH2:R_WHH2 + H_SIZE] = np.asarray(whh2).T
    p[R_B2] = np.asarray(bi2) + np.asarray(bh2)
    p[R_FCW:R_FCW + H_SIZE, :OUTPUTS] = np.asarray(fc_w).T
    p[R_FCB, :OUTPUTS] = np.asarray(fc_b)
    # per-lane gate scale: 0.5 on i/f/o columns, 1.0 on g columns
    scale = np.full((G,), 0.5, np.float32)
    scale[2 * H_SIZE:3 * H_SIZE] = 1.0
    p[R_SCL] = scale
    return jnp.asarray(p)


# ---------------------------------------------------------------------------
# Pure-JAX reference (PyTorch LSTM semantics, gate order i,f,g,o)
# ---------------------------------------------------------------------------
def reference_forward(x, raw):
    layers, fc_w, fc_b = raw
    B = x.shape[0]
    H = H_SIZE

    def cell(gates, c_prev):
        i = jax.nn.sigmoid(gates[:, 0 * H:1 * H])
        f = jax.nn.sigmoid(gates[:, 1 * H:2 * H])
        g = jnp.tanh(gates[:, 2 * H:3 * H])
        o = jax.nn.sigmoid(gates[:, 3 * H:4 * H])
        c_new = f * c_prev + i * g
        return o * jnp.tanh(c_new), c_new

    h = [jnp.zeros((B, H), jnp.float32) for _ in range(LAYERS)]
    c = [jnp.zeros((B, H), jnp.float32) for _ in range(LAYERS)]
    for t in range(x.shape[1]):
        inp = x[:, t, :]
        for l, (w_ih, w_hh, b_ih, b_hh) in enumerate(layers):
            gates = inp @ w_ih.T + h[l] @ w_hh.T + b_ih + b_hh
            h[l], c[l] = cell(gates, c[l])
            inp = h[l]
    return h[-1] @ fc_w.T + fc_b


if __name__ == "__main__":
    key = jax.random.PRNGKey(0)
    pkey, xkey = jax.random.split(key)

    raw_params = init_raw_params(pkey)
    packed = pack_params(raw_params)
    x = jax.random.normal(xkey, (BATCH, SEQ, INPUTS), jnp.float32)

    out = jax.block_until_ready(lstm_forward(x, packed))
    ref = jax.block_until_ready(reference_forward(x, raw_params))

    np.testing.assert_allclose(np.asarray(out, dtype=np.float32),
                               np.asarray(ref, dtype=np.float32),
                               rtol=5e-3, atol=5e-3)

    print("KERNEL_OK")
</pallas_src>

<mosaic_0001>
module attributes {stable_mosaic.version = 11 : i64} {
  func.func @_lstm_kernel(%arg0: memref<64x8xf32, #tpu.memory_space<vmem>>, %arg1: memref<240x128xf32, #tpu.memory_space<vmem>>, %arg2: memref<8x128xf32, #tpu.memory_space<vmem>>, %arg3: memref<64x128xf32, #tpu.memory_space<vmem>>) attributes {dimension_semantics = [], scalar_prefetch = 0 : i64, scratch_operands = 1 : i64, tpu.core_type = #tpu.core_type<tc>} {
    %c0 = arith.constant 0 : index
    %c0_0 = arith.constant 0 : index
    %0 = vector.load %arg1[%c0, %c0_0] : memref<240x128xf32, #tpu.memory_space<vmem>>, vector<8x128xf32>
    %c8 = arith.constant 8 : index
    %c0_1 = arith.constant 0 : index
    %1 = vector.load %arg1[%c8, %c0_1] : memref<240x128xf32, #tpu.memory_space<vmem>>, vector<32x128xf32>
    %c48 = arith.constant 48 : index
    %c0_2 = arith.constant 0 : index
    %2 = vector.load %arg1[%c48, %c0_2] : memref<240x128xf32, #tpu.memory_space<vmem>>, vector<32x128xf32>
    %c80 = arith.constant 80 : index
    %c0_3 = arith.constant 0 : index
    %3 = vector.load %arg1[%c80, %c0_3] : memref<240x128xf32, #tpu.memory_space<vmem>>, vector<32x128xf32>
    %c120 = arith.constant 120 : index
    %c0_4 = arith.constant 0 : index
    %4 = vector.load %arg1[%c120, %c0_4] : memref<240x128xf32, #tpu.memory_space<vmem>>, vector<32x128xf32>
    %c152 = arith.constant 152 : index
    %c0_5 = arith.constant 0 : index
    %5 = vector.load %arg1[%c152, %c0_5] : memref<240x128xf32, #tpu.memory_space<vmem>>, vector<32x128xf32>
    %c112 = arith.constant 112 : index
    %c0_6 = arith.constant 0 : index
    %6 = vector.load %arg1[%c112, %c0_6] : memref<240x128xf32, #tpu.memory_space<vmem>>, vector<1x128xf32>
    %7 = vector.shape_cast %6 : vector<1x128xf32> to vector<1x128xf32>
    %8 = vector.broadcast %7 : vector<1x128xf32> to vector<8x128xf32>
    %c184 = arith.constant 184 : index
    %c0_7 = arith.constant 0 : index
    %9 = vector.load %arg1[%c184, %c0_7] : memref<240x128xf32, #tpu.memory_space<vmem>>, vector<1x128xf32>
    %10 = vector.shape_cast %9 : vector<1x128xf32> to vector<1x128xf32>
    %11 = vector.broadcast %10 : vector<1x128xf32> to vector<8x128xf32>
    %c232 = arith.constant 232 : index
    %c0_8 = arith.constant 0 : index
    %12 = vector.load %arg1[%c232, %c0_8] : memref<240x128xf32, #tpu.memory_space<vmem>>, vector<1x128xf32>
    %13 = vector.shape_cast %12 : vector<1x128xf32> to vector<1x128xf32>
    %14 = vector.broadcast %13 : vector<1x128xf32> to vector<8x128xf32>
    %c0_9 = arith.constant 0 : index
    %c0_10 = arith.constant 0 : index
    %15 = vector.load %arg0[%c0_9, %c0_10] : memref<64x8xf32, #tpu.memory_space<vmem>>, vector<64x8xf32>
    %cst = arith.constant dense<0.000000e+00> : vector<64x128xf32>
    %16 = tpu.matmul %15, %0, %cst {dimension_numbers = #tpu.dot_dimension_numbers<[1], [0], [0], [1], [0, 0, 1, 1], [], []>} : vector<64x8xf32>, vector<8x128xf32>, vector<64x128xf32> -> vector<64x128xf32>
    %c40 = arith.constant 40 : index
    %c0_11 = arith.constant 0 : index
    %17 = vector.load %arg1[%c40, %c0_11] : memref<240x128xf32, #tpu.memory_space<vmem>>, vector<1x128xf32>
    %18 = vector.broadcast %17 : vector<1x128xf32> to vector<64x128xf32>
    %19 = arith.addf %16, %18 : vector<64x128xf32>
    %c0_12 = arith.constant 0 : index
    %c0_13 = arith.constant 0 : index
    %20 = vector.load %arg3[%c0_12, %c0_13] : memref<64x128xf32, #tpu.memory_space<vmem>>, vector<64x128xf32>
    tpu.vector_store %arg3[%c0_12, %c0_13], %19 {strides = array<i32>} : memref<64x128xf32, #tpu.memory_space<vmem>>, vector<64x128xf32>,
    %cst_14 = arith.constant 0.000000e+00 : f32
    %21 = vector.broadcast %cst_14 : f32 to vector<8x32xf32>
    %c0_15 = arith.constant 0 : index
    %c0_16 = arith.constant 0 : index
    %22 = vector.load %arg3[%c0_15, %c0_16] : memref<64x128xf32, #tpu.memory_space<vmem>>, vector<8x128xf32>
    %23 = arith.mulf %22, %14 : vector<8x128xf32>
    %24 = math.tanh %23 : vector<8x128xf32>
    %cst_17 = arith.constant 5.000000e-01 : f32
    %25 = vector.broadcast %cst_17 : f32 to vector<8x128xf32>
    %26 = arith.mulf %25, %24 : vector<8x128xf32>
    %cst_18 = arith.constant 5.000000e-01 : f32
    %27 = vector.broadcast %cst_18 : f32 to vector<8x128xf32>
    %28 = arith.addf %26, %27 : vector<8x128xf32>
    %29 = vector.extract_strided_slice %28 {offsets = [0, 0], sizes = [8, 32], strides = [1, 1]} : vector<8x128xf32> to vector<8x32xf32>
    %30 = vector.extract_strided_slice %28 {offsets = [0, 32], sizes = [8, 32], strides = [1, 1]} : vector<8x128xf32> to vector<8x32xf32>
    %31 = vector.extract_strided_slice %24 {offsets = [0, 64], sizes = [8, 32], strides = [1, 1]} : vector<8x128xf32> to vector<8x32xf32>
    %32 = vector.extract_strided_slice %28 {offsets = [0, 96], sizes = [8, 32], strides = [1, 1]} : vector<8x128xf32> to vector<8x32xf32>
    %33 = arith.mulf %30, %21 : vector<8x32xf32>
    %34 = arith.mulf %29, %31 : vector<8x32xf32>
    %35 = arith.addf %33, %34 : vector<8x32xf32>
    %36 = math.tanh %35 : vector<8x32xf32>
    %37 = arith.mulf %32, %36 : vector<8x32xf32>
    %c8_19 = arith.constant 8 : index
    %c0_20 = arith.constant 0 : index
    %38 = vector.load %arg3[%c8_19, %c0_20] : memref<64x128xf32, #tpu.memory_space<vmem>>, vector<8x128xf32>
    %cst_21 = arith.constant dense<0.000000e+00> : vector<8x128xf32>
    %39 = tpu.matmul %37, %1, %cst_21 {dimension_numbers = #tpu.dot_dimension_numbers<[1], [0], [0], [1], [0, 0, 1, 1], [], []>} : vector<8x32xf32>, vector<32x128xf32>, vector<8x128xf32> -> vector<8x128xf32>
    %40 = arith.addf %38, %39 : vector<8x128xf32>
    %41 = arith.mulf %40, %14 : vector<8x128xf32>
    %42 = math.tanh %41 : vector<8x128xf32>
    %cst_22 = arith.constant 5.000000e-01 : f32
    %43 = vector.broadcast %cst_22 : f32 to vector<8x128xf32>
    %44 = arith.mulf %43, %42 : vector<8x128xf32>
    %cst_23 = arith.constant 5.000000e-01 : f32
    %45 = vector.broadcast %cst_23 : f32 to vector<8x128xf32>
    %46 = arith.addf %44, %45 : vector<8x128xf32>
    %47 = vector.extract_strided_slice %46 {offsets = [0, 0], sizes = [8, 32], strides = [1, 1]} : vector<8x128xf32> to vector<8x32xf32>
    %48 = vector.extract_strided_slice %46 {offsets = [0, 32], sizes = [8, 32], strides = [1, 1]} : vector<8x128xf32> to vector<8x32xf32>
    %49 = vector.extract_strided_slice %42 {offsets = [0, 64], sizes = [8, 32], strides = [1, 1]} : vector<8x128xf32> to vector<8x32xf32>
    %50 = vector.extract_strided_slice %46 {offsets = [0, 96], sizes = [8, 32], strides = [1, 1]} : vector<8x128xf32> to vector<8x32xf32>
    %51 = arith.mulf %48, %35 : vector<8x32xf32>
    %52 = arith.mulf %47, %49 : vector<8x32xf32>
    %53 = arith.addf %51, %52 : vector<8x32xf32>
    %54 = math.tanh %53 : vector<8x32xf32>
    %55 = arith.mulf %50, %54 : vector<8x32xf32>
    %cst_24 = arith.constant dense<0.000000e+00> : vector<8x128xf32>
    %56 = tpu.matmul %37, %2, %cst_24 {dimension_numbers = #tpu.dot_dimension_numbers<[1], [0], [0], [1], [0, 0, 1, 1], [], []>} : vector<8x32xf32>, vector<32x128xf32>, vector<8x128xf32> -> vector<8x128xf32>
    %57 = arith.addf %56, %8 : vector<8x128xf32>
    %58 = arith.mulf %57, %14 : vector<8x128xf32>
    %59 = math.tanh %58 : vector<8x128xf32>
    %cst_25 = arith.constant 5.000000e-01 : f32
    %60 = vector.broadcast %cst_25 : f32 to vector<8x128xf32>
    %61 = arith.mulf %60, %59 : vector<8x128xf32>
    %cst_26 = arith.constant 5.000000e-01 : f32
    %62 = vector.broadcast %cst_26 : f32 to vector<8x128xf32>
    %63 = arith.addf %61, %62 : vector<8x128xf32>
    %64 = vector.extract_strided_slice %63 {offsets = [0, 0], sizes = [8, 32], strides = [1, 1]} : vector<8x128xf32> to vector<8x32xf32>
    %65 = vector.extract_strided_slice %63 {offsets = [0, 32], sizes = [8, 32], strides = [1, 1]} : vector<8x128xf32> to vector<8x32xf32>
    %66 = vector.extract_strided_slice %59 {offsets = [0, 64], sizes = [8, 32], strides = [1, 1]} : vector<8x128xf32> to vector<8x32xf32>
    %67 = vector.extract_strided_slice %63 {offsets = [0, 96], sizes = [8, 32], strides = [1, 1]} : vector<8x128xf32> to vector<8x32xf32>
    %68 = arith.mulf %65, %21 : vector<8x32xf32>
    %69 = arith.mulf %64, %66 : vector<8x32xf32>
    %70 = arith.addf %68, %69 : vector<8x32xf32>
    %71 = math.tanh %70 : vector<8x32xf32>
    %72 = arith.mulf %67, %71 : vector<8x32xf32>
    %c16 = arith.constant 16 : index
    %c0_27 = arith.constant 0 : index
    %73 = vector.load %arg3[%c16, %c0_27] : memref<64x128xf32, #tpu.memory_space<vmem>>, vector<8x128xf32>
    %cst_28 = arith.constant dense<0.000000e+00> : vector<8x128xf32>
    %74 = tpu.matmul %55, %1, %cst_28 {dimension_numbers = #tpu.dot_dimension_numbers<[1], [0], [0], [1], [0, 0, 1, 1], [], []>} : vector<8x32xf32>, vector<32x128xf32>, vector<8x128xf32> -> vector<8x128xf32>
    %75 = arith.addf %73, %74 : vector<8x128xf32>
    %76 = arith.mulf %75, %14 : vector<8x128xf32>
    %77 = math.tanh %76 : vector<8x128xf32>
    %cst_29 = arith.constant 5.000000e-01 : f32
    %78 = vector.broadcast %cst_29 : f32 to vector<8x128xf32>
    %79 = arith.mulf %78, %77 : vector<8x128xf32>
    %cst_30 = arith.constant 5.000000e-01 : f32
    %80 = vector.broadcast %cst_30 : f32 to vector<8x128xf32>
    %81 = arith.addf %79, %80 : vector<8x128xf32>
    %82 = vector.extract_strided_slice %81 {offsets = [0, 0], sizes = [8, 32], strides = [1, 1]} : vector<8x128xf32> to vector<8x32xf32>
    %83 = vector.extract_strided_slice %81 {offsets = [0, 32], sizes = [8, 32], strides = [1, 1]} : vector<8x128xf32> to vector<8x32xf32>
    %84 = vector.extract_strided_slice %77 {offsets = [0, 64], sizes = [8, 32], strides = [1, 1]} : vector<8x128xf32> to vector<8x32xf32>
    %85 = vector.extract_strided_slice %81 {offsets = [0, 96], sizes = [8, 32], strides = [1, 1]} : vector<8x128xf32> to vector<8x32xf32>
    %86 = arith.mulf %83, %53 : vector<8x32xf32>
    %87 = arith.mulf %82, %84 : vector<8x32xf32>
    %88 = arith.addf %86, %87 : vector<8x32xf32>
    %89 = math.tanh %88 : vector<8x32xf32>
    %90 = arith.mulf %85, %89 : vector<8x32xf32>
    %cst_31 = arith.constant dense<0.000000e+00> : vector<8x128xf32>
    %91 = tpu.matmul %55, %2, %cst_31 {dimension_numbers = #tpu.dot_dimension_numbers<[1], [0], [0], [1], [0, 0, 1, 1], [], []>} : vector<8x32xf32>, vector<32x128xf32>, vector<8x128xf32> -> vector<8x128xf32>
    %92 = arith.addf %91, %8 : vector<8x128xf32>
    %cst_32 = arith.constant dense<0.000000e+00> : vector<8x128xf32>
    %93 = tpu.matmul %72, %3, %cst_32 {dimension_numbers = #tpu.dot_dimension_numbers<[1], [0], [0], [1], [0, 0, 1, 1], [], []>} : vector<8x32xf32>, vector<32x128xf32>, vector<8x128xf32> -> vector<8x128xf32>
    %94 = arith.addf %92, %93 : vector<8x128xf32>
    %95 = arith.mulf %94, %14 : vector<8x128xf32>
    %96 = math.tanh %95 : vector<8x128xf32>
    %cst_33 = arith.constant 5.000000e-01 : f32
    %97 = vector.broadcast %cst_33 : f32 to vector<8x128xf32>
    %98 = arith.mulf %97, %96 : vector<8x128xf32>
    %cst_34 = arith.constant 5.000000e-01 : f32
    %99 = vector.broadcast %cst_34 : f32 to vector<8x128xf32>
    %100 = arith.addf %98, %99 : vector<8x128xf32>
    %101 = vector.extract_strided_slice %100 {offsets = [0, 0], sizes = [8, 32], strides = [1, 1]} : vector<8x128xf32> to vector<8x32xf32>
    %102 = vector.extract_strided_slice %100 {offsets = [0, 32], sizes = [8, 32], strides = [1, 1]} : vector<8x128xf32> to vector<8x32xf32>
    %103 = vector.extract_strided_slice %96 {offsets = [0, 64], sizes = [8, 32], strides = [1, 1]} : vector<8x128xf32> to vector<8x32xf32>
    %104 = vector.extract_strided_slice %100 {offsets = [0, 96], sizes = [8, 32], strides = [1, 1]} : vector<8x128xf32> to vector<8x32xf32>
    %105 = arith.mulf %102, %70 : vector<8x32xf32>
    %106 = arith.mulf %101, %103 : vector<8x32xf32>
    %107 = arith.addf %105, %106 : vector<8x32xf32>
    %108 = math.tanh %107 : vector<8x32xf32>
    %109 = arith.mulf %104, %108 : vector<8x32xf32>
    %cst_35 = arith.constant dense<0.000000e+00> : vector<8x128xf32>
    %110 = tpu.matmul %72, %4, %cst_35 {dimension_numbers = #tpu.dot_dimension_numbers<[1], [0], [0], [1], [0, 0, 1, 1], [], []>} : vector<8x32xf32>, vector<32x128xf32>, vector<8x128xf32> -> vector<8x128xf32>
    %111 = arith.addf %110, %11 : vector<8x128xf32>
    %112 = arith.mulf %111, %14 : vector<8x128xf32>
    %113 = math.tanh %112 : vector<8x128xf32>
    %cst_36 = arith.constant 5.000000e-01 : f32
    %114 = vector.broadcast %cst_36 : f32 to vector<8x128xf32>
    %115 = arith.mulf %114, %113 : vector<8x128xf32>
    %cst_37 = arith.constant 5.000000e-01 : f32
    %116 = vector.broadcast %cst_37 : f32 to vector<8x128xf32>
    %117 = arith.addf %115, %116 : vector<8x128xf32>
    %118 = vector.extract_strided_slice %117 {offsets = [0, 0], sizes = [8, 32], strides = [1, 1]} : vector<8x128xf32> to vector<8x32xf32>
    %119 = vector.extract_strided_slice %117 {offsets = [0, 32], sizes = [8, 32], strides = [1, 1]} : vector<8x128xf32> to vector<8x32xf32>
    %120 = vector.extract_strided_slice %113 {offsets = [0, 64], sizes = [8, 32], strides = [1, 1]} : vector<8x128xf32> to vector<8x32xf32>
    %121 = vector.extract_strided_slice %117 {offsets = [0, 96], sizes = [8, 32], strides = [1, 1]} : vector<8x128xf32> to vector<8x32xf32>
    %122 = arith.mulf %119, %21 : vector<8x32xf32>
    %123 = arith.mulf %118, %120 : vector<8x32xf32>
    %124 = arith.addf %122, %123 : vector<8x32xf32>
    %125 = math.tanh %124 : vector<8x32xf32>
    %126 = arith.mulf %121, %125 : vector<8x32xf32>
    %c24 = arith.constant 24 : index
    %c0_38 = arith.constant 0 : index
    %127 = vector.load %arg3[%c24, %c0_38] : memref<64x128xf32, #tpu.memory_space<vmem>>, vector<8x128xf32>
    %cst_39 = arith.constant dense<0.000000e+00> : vector<8x128xf32>
    %128 = tpu.matmul %90, %1, %cst_39 {dimension_numbers = #tpu.dot_dimension_numbers<[1], [0], [0], [1], [0, 0, 1, 1], [], []>} : vector<8x32xf32>, vector<32x128xf32>, vector<8x128xf32> -> vector<8x128xf32>
    %129 = arith.addf %127, %128 : vector<8x128xf32>
    %130 = arith.mulf %129, %14 : vector<8x128xf32>
    %131 = math.tanh %130 : vector<8x128xf32>
    %cst_40 = arith.constant 5.000000e-01 : f32
    %132 = vector.broadcast %cst_40 : f32 to vector<8x128xf32>
    %133 = arith.mulf %132, %131 : vector<8x128xf32>
    %cst_41 = arith.constant 5.000000e-01 : f32
    %134 = vector.broadcast %cst_41 : f32 to vector<8x128xf32>
    %135 = arith.addf %133, %134 : vector<8x128xf32>
    %136 = vector.extract_strided_slice %135 {offsets = [0, 0], sizes = [8, 32], strides = [1, 1]} : vector<8x128xf32> to vector<8x32xf32>
    %137 = vector.extract_strided_slice %135 {offsets = [0, 32], sizes = [8, 32], strides = [1, 1]} : vector<8x128xf32> to vector<8x32xf32>
    %138 = vector.extract_strided_slice %131 {offsets = [0, 64], sizes = [8, 32], strides = [1, 1]} : vector<8x128xf32> to vector<8x32xf32>
    %139 = vector.extract_strided_slice %135 {offsets = [0, 96], sizes = [8, 32], strides = [1, 1]} : vector<8x128xf32> to vector<8x32xf32>
    %140 = arith.mulf %137, %88 : vector<8x32xf32>
    %141 = arith.mulf %136, %138 : vector<8x32xf32>
    %142 = arith.addf %140, %141 : vector<8x32xf32>
    %143 = math.tanh %142 : vector<8x32xf32>
    %144 = arith.mulf %139, %143 : vector<8x32xf32>
    %cst_42 = arith.constant dense<0.000000e+00> : vector<8x128xf32>
    %145 = tpu.matmul %90, %2, %cst_42 {dimension_numbers = #tpu.dot_dimension_numbers<[1], [0], [0], [1], [0, 0, 1, 1], [], []>} : vector<8x32xf32>, vector<32x128xf32>, vector<8x128xf32> -> vector<8x128xf32>
    %146 = arith.addf %145, %8 : vector<8x128xf32>
    %cst_43 = arith.constant dense<0.000000e+00> : vector<8x128xf32>
    %147 = tpu.matmul %109, %3, %cst_43 {dimension_numbers = #tpu.dot_dimension_numbers<[1], [0], [0], [1], [0, 0, 1, 1], [], []>} : vector<8x32xf32>, vector<32x128xf32>, vector<8x128xf32> -> vector<8x128xf32>
    %148 = arith.addf %146, %147 : vector<8x128xf32>
    %149 = arith.mulf %148, %14 : vector<8x128xf32>
    %150 = math.tanh %149 : vector<8x128xf32>
    %cst_44 = arith.constant 5.000000e-01 : f32
    %151 = vector.broadcast %cst_44 : f32 to vector<8x128xf32>
    %152 = arith.mulf %151, %150 : vector<8x128xf32>
    %cst_45 = arith.constant 5.000000e-01 : f32
    %153 = vector.broadcast %cst_45 : f32 to vector<8x128xf32>
    %154 = arith.addf %152, %153 : vector<8x128xf32>
    %155 = vector.extract_strided_slice %154 {offsets = [0, 0], sizes = [8, 32], strides = [1, 1]} : vector<8x128xf32> to vector<8x32xf32>
    %156 = vector.extract_strided_slice %154 {offsets = [0, 32], sizes = [8, 32], strides = [1, 1]} : vector<8x128xf32> to vector<8x32xf32>
    %157 = vector.extract_strided_slice %150 {offsets = [0, 64], sizes = [8, 32], strides = [1, 1]} : vector<8x128xf32> to vector<8x32xf32>
    %158 = vector.extract_strided_slice %154 {offsets = [0, 96], sizes = [8, 32], strides = [1, 1]} : vector<8x128xf32> to vector<8x32xf32>
    %159 = arith.mulf %156, %107 : vector<8x32xf32>
    %160 = arith.mulf %155, %157 : vector<8x32xf32>
    %161 = arith.addf %159, %160 : vector<8x32xf32>
    %162 = math.tanh %161 : vector<8x32xf32>
    %163 = arith.mulf %158, %162 : vector<8x32xf32>
    %cst_46 = arith.constant dense<0.000000e+00> : vector<8x128xf32>
    %164 = tpu.matmul %109, %4, %cst_46 {dimension_numbers = #tpu.dot_dimension_numbers<[1], [0], [0], [1], [0, 0, 1, 1], [], []>} : vector<8x32xf32>, vector<32x128xf32>, vector<8x128xf32> -> vector<8x128xf32>
    %165 = arith.addf %164, %11 : vector<8x128xf32>
    %cst_47 = arith.constant dense<0.000000e+00> : vector<8x128xf32>
    %166 = tpu.matmul %126, %5, %cst_47 {dimension_numbers = #tpu.dot_dimension_numbers<[1], [0], [0], [1], [0, 0, 1, 1], [], []>} : vector<8x32xf32>, vector<32x128xf32>, vector<8x128xf32> -> vector<8x128xf32>
    %167 = arith.addf %165, %166 : vector<8x128xf32>
    %168 = arith.mulf %167, %14 : vector<8x128xf32>
    %169 = math.tanh %168 : vector<8x128xf32>
    %cst_48 = arith.constant 5.000000e-01 : f32
    %170 = vector.broadcast %cst_48 : f32 to vector<8x128xf32>
    %171 = arith.mulf %170, %169 : vector<8x128xf32>
    %cst_49 = arith.constant 5.000000e-01 : f32
    %172 = vector.broadcast %cst_49 : f32 to vector<8x128xf32>
    %173 = arith.addf %171, %172 : vector<8x128xf32>
    %174 = vector.extract_strided_slice %173 {offsets = [0, 0], sizes = [8, 32], strides = [1, 1]} : vector<8x128xf32> to vector<8x32xf32>
    %175 = vector.extract_strided_slice %173 {offsets = [0, 32], sizes = [8, 32], strides = [1, 1]} : vector<8x128xf32> to vector<8x32xf32>
    %176 = vector.extract_strided_slice %169 {offsets = [0, 64], sizes = [8, 32], strides = [1, 1]} : vector<8x128xf32> to vector<8x32xf32>
    %177 = vector.extract_strided_slice %173 {offsets = [0, 96], sizes = [8, 32], strides = [1, 1]} : vector<8x128xf32> to vector<8x32xf32>
    %178 = arith.mulf %175, %124 : vector<8x32xf32>
    %179 = arith.mulf %174, %176 : vector<8x32xf32>
    %180 = arith.addf %178, %179 : vector<8x32xf32>
    %181 = math.tanh %180 : vector<8x32xf32>
    %182 = arith.mulf %177, %181 : vector<8x32xf32>
    %c32 = arith.constant 32 : index
    %c0_50 = arith.constant 0 : index
    %183 = vector.load %arg3[%c32, %c0_50] : memref<64x128xf32, #tpu.memory_space<vmem>>, vector<8x128xf32>
    %cst_51 = arith.constant dense<0.000000e+00> : vector<8x128xf32>
    %184 = tpu.matmul %144, %1, %cst_51 {dimension_numbers = #tpu.dot_dimension_numbers<[1], [0], [0], [1], [0, 0, 1, 1], [], []>} : vector<8x32xf32>, vector<32x128xf32>, vector<8x128xf32> -> vector<8x128xf32>
    %185 = arith.addf %183, %184 : vector<8x128xf32>
    %186 = arith.mulf %185, %14 : vector<8x128xf32>
    %187 = math.tanh %186 : vector<8x128xf32>
    %cst_52 = arith.constant 5.000000e-01 : f32
    %188 = vector.broadcast %cst_52 : f32 to vector<8x128xf32>
    %189 = arith.mulf %188, %187 : vector<8x128xf32>
    %cst_53 = arith.constant 5.000000e-01 : f32
    %190 = vector.broadcast %cst_53 : f32 to vector<8x128xf32>
    %191 = arith.addf %189, %190 : vector<8x128xf32>
    %192 = vector.extract_strided_slice %191 {offsets = [0, 0], sizes = [8, 32], strides = [1, 1]} : vector<8x128xf32> to vector<8x32xf32>
    %193 = vector.extract_strided_slice %191 {offsets = [0, 32], sizes = [8, 32], strides = [1, 1]} : vector<8x128xf32> to vector<8x32xf32>
    %194 = vector.extract_strided_slice %187 {offsets = [0, 64], sizes = [8, 32], strides = [1, 1]} : vector<8x128xf32> to vector<8x32xf32>
    %195 = vector.extract_strided_slice %191 {offsets = [0, 96], sizes = [8, 32], strides = [1, 1]} : vector<8x128xf32> to vector<8x32xf32>
    %196 = arith.mulf %193, %142 : vector<8x32xf32>
    %197 = arith.mulf %192, %194 : vector<8x32xf32>
    %198 = arith.addf %196, %197 : vector<8x32xf32>
    %199 = math.tanh %198 : vector<8x32xf32>
    %200 = arith.mulf %195, %199 : vector<8x32xf32>
    %cst_54 = arith.constant dense<0.000000e+00> : vector<8x128xf32>
    %201 = tpu.matmul %144, %2, %cst_54 {dimension_numbers = #tpu.dot_dimension_numbers<[1], [0], [0], [1], [0, 0, 1, 1], [], []>} : vector<8x32xf32>, vector<32x128xf32>, vector<8x128xf32> -> vector<8x128xf32>
    %202 = arith.addf %201, %8 : vector<8x128xf32>
    %cst_55 = arith.constant dense<0.000000e+00> : vector<8x128xf32>
    %203 = tpu.matmul %163, %3, %cst_55 {dimension_numbers = #tpu.dot_dimension_numbers<[1], [0], [0], [1], [0, 0, 1, 1], [], []>} : vector<8x32xf32>, vector<32x128xf32>, vector<8x128xf32> -> vector<8x128xf32>
    %204 = arith.addf %202, %203 : vector<8x128xf32>
    %205 = arith.mulf %204, %14 : vector<8x128xf32>
    %206 = math.tanh %205 : vector<8x128xf32>
    %cst_56 = arith.constant 5.000000e-01 : f32
    %207 = vector.broadcast %cst_56 : f32 to vector<8x128xf32>
    %208 = arith.mulf %207, %206 : vector<8x128xf32>
    %cst_57 = arith.constant 5.000000e-01 : f32
    %209 = vector.broadcast %cst_57 : f32 to vector<8x128xf32>
    %210 = arith.addf %208, %209 : vector<8x128xf32>
    %211 = vector.extract_strided_slice %210 {offsets = [0, 0], sizes = [8, 32], strides = [1, 1]} : vector<8x128xf32> to vector<8x32xf32>
    %212 = vector.extract_strided_slice %210 {offsets = [0, 32], sizes = [8, 32], strides = [1, 1]} : vector<8x128xf32> to vector<8x32xf32>
    %213 = vector.extract_strided_slice %206 {offsets = [0, 64], sizes = [8, 32], strides = [1, 1]} : vector<8x128xf32> to vector<8x32xf32>
    %214 = vector.extract_strided_slice %210 {offsets = [0, 96], sizes = [8, 32], strides = [1, 1]} : vector<8x128xf32> to vector<8x32xf32>
    %215 = arith.mulf %212, %161 : vector<8x32xf32>
    %216 = arith.mulf %211, %213 : vector<8x32xf32>
    %217 = arith.addf %215, %216 : vector<8x32xf32>
    %218 = math.tanh %217 : vector<8x32xf32>
    %219 = arith.mulf %214, %218 : vector<8x32xf32>
    %cst_58 = arith.constant dense<0.000000e+00> : vector<8x128xf32>
    %220 = tpu.matmul %163, %4, %cst_58 {dimension_numbers = #tpu.dot_dimension_numbers<[1], [0], [0], [1], [0, 0, 1, 1], [], []>} : vector<8x32xf32>, vector<32x128xf32>, vector<8x128xf32> -> vector<8x128xf32>
    %221 = arith.addf %220, %11 : vector<8x128xf32>
    %cst_59 = arith.constant dense<0.000000e+00> : vector<8x128xf32>
    %222 = tpu.matmul %182, %5, %cst_59 {dimension_numbers = #tpu.dot_dimension_numbers<[1], [0], [0], [1], [0, 0, 1, 1], [], []>} : vector<8x32xf32>, vector<32x128xf32>, vector<8x128xf32> -> vector<8x128xf32>
    %223 = arith.addf %221, %222 : vector<8x128xf32>
    %224 = arith.mulf %223, %14 : vector<8x128xf32>
    %225 = math.tanh %224 : vector<8x128xf32>
    %cst_60 = arith.constant 5.000000e-01 : f32
    %226 = vector.broadcast %cst_60 : f32 to vector<8x128xf32>
    %227 = arith.mulf %226, %225 : vector<8x128xf32>
    %cst_61 = arith.constant 5.000000e-01 : f32
    %228 = vector.broadcast %cst_61 : f32 to vector<8x128xf32>
    %229 = arith.addf %227, %228 : vector<8x128xf32>
    %230 = vector.extract_strided_slice %229 {offsets = [0, 0], sizes = [8, 32], strides = [1, 1]} : vector<8x128xf32> to vector<8x32xf32>
    %231 = vector.extract_strided_slice %229 {offsets = [0, 32], sizes = [8, 32], strides = [1, 1]} : vector<8x128xf32> to vector<8x32xf32>
    %232 = vector.extract_strided_slice %225 {offsets = [0, 64], sizes = [8, 32], strides = [1, 1]} : vector<8x128xf32> to vector<8x32xf32>
    %233 = vector.extract_strided_slice %229 {offsets = [0, 96], sizes = [8, 32], strides = [1, 1]} : vector<8x128xf32> to vector<8x32xf32>
    %234 = arith.mulf %231, %180 : vector<8x32xf32>
    %235 = arith.mulf %230, %232 : vector<8x32xf32>
    %236 = arith.addf %234, %235 : vector<8x32xf32>
    %237 = math.tanh %236 : vector<8x32xf32>
    %238 = arith.mulf %233, %237 : vector<8x32xf32>
    %c40_62 = arith.constant 40 : index
    %c0_63 = arith.constant 0 : index
    %239 = vector.load %arg3[%c40_62, %c0_63] : memref<64x128xf32, #tpu.memory_space<vmem>>, vector<8x128xf32>
    %cst_64 = arith.constant dense<0.000000e+00> : vector<8x128xf32>
    %240 = tpu.matmul %200, %1, %cst_64 {dimension_numbers = #tpu.dot_dimension_numbers<[1], [0], [0], [1], [0, 0, 1, 1], [], []>} : vector<8x32xf32>, vector<32x128xf32>, vector<8x128xf32> -> vector<8x128xf32>
    %241 = arith.addf %239, %240 : vector<8x128xf32>
    %242 = arith.mulf %241, %14 : vector<8x128xf32>
    %243 = math.tanh %242 : vector<8x128xf32>
    %cst_65 = arith.constant 5.000000e-01 : f32
    %244 = vector.broadcast %cst_65 : f32 to vector<8x128xf32>
    %245 = arith.mulf %244, %243 : vector<8x128xf32>
    %cst_66 = arith.constant 5.000000e-01 : f32
    %246 = vector.broadcast %cst_66 : f32 to vector<8x128xf32>
    %247 = arith.addf %245, %246 : vector<8x128xf32>
    %248 = vector.extract_strided_slice %247 {offsets = [0, 0], sizes = [8, 32], strides = [1, 1]} : vector<8x128xf32> to vector<8x32xf32>
    %249 = vector.extract_strided_slice %247 {offsets = [0, 32], sizes = [8, 32], strides = [1, 1]} : vector<8x128xf32> to vector<8x32xf32>
    %250 = vector.extract_strided_slice %243 {offsets = [0, 64], sizes = [8, 32], strides = [1, 1]} : vector<8x128xf32> to vector<8x32xf32>
    %251 = vector.extract_strided_slice %247 {offsets = [0, 96], sizes = [8, 32], strides = [1, 1]} : vector<8x128xf32> to vector<8x32xf32>
    %252 = arith.mulf %249, %198 : vector<8x32xf32>
    %253 = arith.mulf %248, %250 : vector<8x32xf32>
    %254 = arith.addf %252, %253 : vector<8x32xf32>
    %255 = math.tanh %254 : vector<8x32xf32>
    %256 = arith.mulf %251, %255 : vector<8x32xf32>
    %cst_67 = arith.constant dense<0.000000e+00> : vector<8x128xf32>
    %257 = tpu.matmul %200, %2, %cst_67 {dimension_numbers = #tpu.dot_dimension_numbers<[1], [0], [0], [1], [0, 0, 1, 1], [], []>} : vector<8x32xf32>, vector<32x128xf32>, vector<8x128xf32> -> vector<8x128xf32>
    %258 = arith.addf %257, %8 : vector<8x128xf32>
    %cst_68 = arith.constant dense<0.000000e+00> : vector<8x128xf32>
    %259 = tpu.matmul %219, %3, %cst_68 {dimension_numbers = #tpu.dot_dimension_numbers<[1], [0], [0], [1], [0, 0, 1, 1], [], []>} : vector<8x32xf32>, vector<32x128xf32>, vector<8x128xf32> -> vector<8x128xf32>
    %260 = arith.addf %258, %259 : vector<8x128xf32>
    %261 = arith.mulf %260, %14 : vector<8x128xf32>
    %262 = math.tanh %261 : vector<8x128xf32>
    %cst_69 = arith.constant 5.000000e-01 : f32
    %263 = vector.broadcast %cst_69 : f32 to vector<8x128xf32>
    %264 = arith.mulf %263, %262 : vector<8x128xf32>
    %cst_70 = arith.constant 5.000000e-01 : f32
    %265 = vector.broadcast %cst_70 : f32 to vector<8x128xf32>
    %266 = arith.addf %264, %265 : vector<8x128xf32>
    %267 = vector.extract_strided_slice %266 {offsets = [0, 0], sizes = [8, 32], strides = [1, 1]} : vector<8x128xf32> to vector<8x32xf32>
    %268 = vector.extract_strided_slice %266 {offsets = [0, 32], sizes = [8, 32], strides = [1, 1]} : vector<8x128xf32> to vector<8x32xf32>
    %269 = vector.extract_strided_slice %262 {offsets = [0, 64], sizes = [8, 32], strides = [1, 1]} : vector<8x128xf32> to vector<8x32xf32>
    %270 = vector.extract_strided_slice %266 {offsets = [0, 96], sizes = [8, 32], strides = [1, 1]} : vector<8x128xf32> to vector<8x32xf32>
    %271 = arith.mulf %268, %217 : vector<8x32xf32>
    %272 = arith.mulf %267, %269 : vector<8x32xf32>
    %273 = arith.addf %271, %272 : vector<8x32xf32>
    %274 = math.tanh %273 : vector<8x32xf32>
    %275 = arith.mulf %270, %274 : vector<8x32xf32>
    %cst_71 = arith.constant dense<0.000000e+00> : vector<8x128xf32>
    %276 = tpu.matmul %219, %4, %cst_71 {dimension_numbers = #tpu.dot_dimension_numbers<[1], [0], [0], [1], [0, 0, 1, 1], [], []>} : vector<8x32xf32>, vector<32x128xf32>, vector<8x128xf32> -> vector<8x128xf32>
    %277 = arith.addf %276, %11 : vector<8x128xf32>
    %cst_72 = arith.constant dense<0.000000e+00> : vector<8x128xf32>
    %278 = tpu.matmul %238, %5, %cst_72 {dimension_numbers = #tpu.dot_dimension_numbers<[1], [0], [0], [1], [0, 0, 1, 1], [], []>} : vector<8x32xf32>, vector<32x128xf32>, vector<8x128xf32> -> vector<8x128xf32>
    %279 = arith.addf %277, %278 : vector<8x128xf32>
    %280 = arith.mulf %279, %14 : vector<8x128xf32>
    %281 = math.tanh %280 : vector<8x128xf32>
    %cst_73 = arith.constant 5.000000e-01 : f32
    %282 = vector.broadcast %cst_73 : f32 to vector<8x128xf32>
    %283 = arith.mulf %282, %281 : vector<8x128xf32>
    %cst_74 = arith.constant 5.000000e-01 : f32
    %284 = vector.broadcast %cst_74 : f32 to vector<8x128xf32>
    %285 = arith.addf %283, %284 : vector<8x128xf32>
    %286 = vector.extract_strided_slice %285 {offsets = [0, 0], sizes = [8, 32], strides = [1, 1]} : vector<8x128xf32> to vector<8x32xf32>
    %287 = vector.extract_strided_slice %285 {offsets = [0, 32], sizes = [8, 32], strides = [1, 1]} : vector<8x128xf32> to vector<8x32xf32>
    %288 = vector.extract_strided_slice %281 {offsets = [0, 64], sizes = [8, 32], strides = [1, 1]} : vector<8x128xf32> to vector<8x32xf32>
    %289 = vector.extract_strided_slice %285 {offsets = [0, 96], sizes = [8, 32], strides = [1, 1]} : vector<8x128xf32> to vector<8x32xf32>
    %290 = arith.mulf %287, %236 : vector<8x32xf32>
    %291 = arith.mulf %286, %288 : vector<8x32xf32>
    %292 = arith.addf %290, %291 : vector<8x32xf32>
    %293 = math.tanh %292 : vector<8x32xf32>
    %294 = arith.mulf %289, %293 : vector<8x32xf32>
    %c48_75 = arith.constant 48 : index
    %c0_76 = arith.constant 0 : index
    %295 = vector.load %arg3[%c48_75, %c0_76] : memref<64x128xf32, #tpu.memory_space<vmem>>, vector<8x128xf32>
    %cst_77 = arith.constant dense<0.000000e+00> : vector<8x128xf32>
    %296 = tpu.matmul %256, %1, %cst_77 {dimension_numbers = #tpu.dot_dimension_numbers<[1], [0], [0], [1], [0, 0, 1, 1], [], []>} : vector<8x32xf32>, vector<32x128xf32>, vector<8x128xf32> -> vector<8x128xf32>
    %297 = arith.addf %295, %296 : vector<8x128xf32>
    %298 = arith.mulf %297, %14 : vector<8x128xf32>
    %299 = math.tanh %298 : vector<8x128xf32>
    %cst_78 = arith.constant 5.000000e-01 : f32
    %300 = vector.broadcast %cst_78 : f32 to vector<8x128xf32>
    %301 = arith.mulf %300, %299 : vector<8x128xf32>
    %cst_79 = arith.constant 5.000000e-01 : f32
    %302 = vector.broadcast %cst_79 : f32 to vector<8x128xf32>
    %303 = arith.addf %301, %302 : vector<8x128xf32>
    %304 = vector.extract_strided_slice %303 {offsets = [0, 0], sizes = [8, 32], strides = [1, 1]} : vector<8x128xf32> to vector<8x32xf32>
    %305 = vector.extract_strided_slice %303 {offsets = [0, 32], sizes = [8, 32], strides = [1, 1]} : vector<8x128xf32> to vector<8x32xf32>
    %306 = vector.extract_strided_slice %299 {offsets = [0, 64], sizes = [8, 32], strides = [1, 1]} : vector<8x128xf32> to vector<8x32xf32>
    %307 = vector.extract_strided_slice %303 {offsets = [0, 96], sizes = [8, 32], strides = [1, 1]} : vector<8x128xf32> to vector<8x32xf32>
    %308 = arith.mulf %305, %254 : vector<8x32xf32>
    %309 = arith.mulf %304, %306 : vector<8x32xf32>
    %310 = arith.addf %308, %309 : vector<8x32xf32>
    %311 = math.tanh %310 : vector<8x32xf32>
    %312 = arith.mulf %307, %311 : vector<8x32xf32>
    %cst_80 = arith.constant dense<0.000000e+00> : vector<8x128xf32>
    %313 = tpu.matmul %256, %2, %cst_80 {dimension_numbers = #tpu.dot_dimension_numbers<[1], [0], [0], [1], [0, 0, 1, 1], [], []>} : vector<8x32xf32>, vector<32x128xf32>, vector<8x128xf32> -> vector<8x128xf32>
    %314 = arith.addf %313, %8 : vector<8x128xf32>
    %cst_81 = arith.constant dense<0.000000e+00> : vector<8x128xf32>
    %315 = tpu.matmul %275, %3, %cst_81 {dimension_numbers = #tpu.dot_dimension_numbers<[1], [0], [0], [1], [0, 0, 1, 1], [], []>} : vector<8x32xf32>, vector<32x128xf32>, vector<8x128xf32> -> vector<8x128xf32>
    %316 = arith.addf %314, %315 : vector<8x128xf32>
    %317 = arith.mulf %316, %14 : vector<8x128xf32>
    %318 = math.tanh %317 : vector<8x128xf32>
    %cst_82 = arith.constant 5.000000e-01 : f32
    %319 = vector.broadcast %cst_82 : f32 to vector<8x128xf32>
    %320 = arith.mulf %319, %318 : vector<8x128xf32>
    %cst_83 = arith.constant 5.000000e-01 : f32
    %321 = vector.broadcast %cst_83 : f32 to vector<8x128xf32>
    %322 = arith.addf %320, %321 : vector<8x128xf32>
    %323 = vector.extract_strided_slice %322 {offsets = [0, 0], sizes = [8, 32], strides = [1, 1]} : vector<8x128xf32> to vector<8x32xf32>
    %324 = vector.extract_strided_slice %322 {offsets = [0, 32], sizes = [8, 32], strides = [1, 1]} : vector<8x128xf32> to vector<8x32xf32>
    %325 = vector.extract_strided_slice %318 {offsets = [0, 64], sizes = [8, 32], strides = [1, 1]} : vector<8x128xf32> to vector<8x32xf32>
    %326 = vector.extract_strided_slice %322 {offsets = [0, 96], sizes = [8, 32], strides = [1, 1]} : vector<8x128xf32> to vector<8x32xf32>
    %327 = arith.mulf %324, %273 : vector<8x32xf32>
    %328 = arith.mulf %323, %325 : vector<8x32xf32>
    %329 = arith.addf %327, %328 : vector<8x32xf32>
    %330 = math.tanh %329 : vector<8x32xf32>
    %331 = arith.mulf %326, %330 : vector<8x32xf32>
    %cst_84 = arith.constant dense<0.000000e+00> : vector<8x128xf32>
    %332 = tpu.matmul %275, %4, %cst_84 {dimension_numbers = #tpu.dot_dimension_numbers<[1], [0], [0], [1], [0, 0, 1, 1], [], []>} : vector<8x32xf32>, vector<32x128xf32>, vector<8x128xf32> -> vector<8x128xf32>
    %333 = arith.addf %332, %11 : vector<8x128xf32>
    %cst_85 = arith.constant dense<0.000000e+00> : vector<8x128xf32>
    %334 = tpu.matmul %294, %5, %cst_85 {dimension_numbers = #tpu.dot_dimension_numbers<[1], [0], [0], [1], [0, 0, 1, 1], [], []>} : vector<8x32xf32>, vector<32x128xf32>, vector<8x128xf32> -> vector<8x128xf32>
    %335 = arith.addf %333, %334 : vector<8x128xf32>
    %336 = arith.mulf %335, %14 : vector<8x128xf32>
    %337 = math.tanh %336 : vector<8x128xf32>
    %cst_86 = arith.constant 5.000000e-01 : f32
    %338 = vector.broadcast %cst_86 : f32 to vector<8x128xf32>
    %339 = arith.mulf %338, %337 : vector<8x128xf32>
    %cst_87 = arith.constant 5.000000e-01 : f32
    %340 = vector.broadcast %cst_87 : f32 to vector<8x128xf32>
    %341 = arith.addf %339, %340 : vector<8x128xf32>
    %342 = vector.extract_strided_slice %341 {offsets = [0, 0], sizes = [8, 32], strides = [1, 1]} : vector<8x128xf32> to vector<8x32xf32>
    %343 = vector.extract_strided_slice %341 {offsets = [0, 32], sizes = [8, 32], strides = [1, 1]} : vector<8x128xf32> to vector<8x32xf32>
    %344 = vector.extract_strided_slice %337 {offsets = [0, 64], sizes = [8, 32], strides = [1, 1]} : vector<8x128xf32> to vector<8x32xf32>
    %345 = vector.extract_strided_slice %341 {offsets = [0, 96], sizes = [8, 32], strides = [1, 1]} : vector<8x128xf32> to vector<8x32xf32>
    %346 = arith.mulf %343, %292 : vector<8x32xf32>
    %347 = arith.mulf %342, %344 : vector<8x32xf32>
    %348 = arith.addf %346, %347 : vector<8x32xf32>
    %349 = math.tanh %348 : vector<8x32xf32>
    %350 = arith.mulf %345, %349 : vector<8x32xf32>
    %c56 = arith.constant 56 : index
    %c0_88 = arith.constant 0 : index
    %351 = vector.load %arg3[%c56, %c0_88] : memref<64x128xf32, #tpu.memory_space<vmem>>, vector<8x128xf32>
    %cst_89 = arith.constant dense<0.000000e+00> : vector<8x128xf32>
    %352 = tpu.matmul %312, %1, %cst_89 {dimension_numbers = #tpu.dot_dimension_numbers<[1], [0], [0], [1], [0, 0, 1, 1], [], []>} : vector<8x32xf32>, vector<32x128xf32>, vector<8x128xf32> -> vector<8x128xf32>
    %353 = arith.addf %351, %352 : vector<8x128xf32>
    %354 = arith.mulf %353, %14 : vector<8x128xf32>
    %355 = math.tanh %354 : vector<8x128xf32>
    %cst_90 = arith.constant 5.000000e-01 : f32
    %356 = vector.broadcast %cst_90 : f32 to vector<8x128xf32>
    %357 = arith.mulf %356, %355 : vector<8x128xf32>
    %cst_91 = arith.constant 5.000000e-01 : f32
    %358 = vector.broadcast %cst_91 : f32 to vector<8x128xf32>
    %359 = arith.addf %357, %358 : vector<8x128xf32>
    %360 = vector.extract_strided_slice %359 {offsets = [0, 0], sizes = [8, 32], strides = [1, 1]} : vector<8x128xf32> to vector<8x32xf32>
    %361 = vector.extract_strided_slice %359 {offsets = [0, 32], sizes = [8, 32], strides = [1, 1]} : vector<8x128xf32> to vector<8x32xf32>
    %362 = vector.extract_strided_slice %355 {offsets = [0, 64], sizes = [8, 32], strides = [1, 1]} : vector<8x128xf32> to vector<8x32xf32>
    %363 = vector.extract_strided_slice %359 {offsets = [0, 96], sizes = [8, 32], strides = [1, 1]} : vector<8x128xf32> to vector<8x32xf32>
    %364 = arith.mulf %361, %310 : vector<8x32xf32>
    %365 = arith.mulf %360, %362 : vector<8x32xf32>
    %366 = arith.addf %364, %365 : vector<8x32xf32>
    %367 = math.tanh %366 : vector<8x32xf32>
    %368 = arith.mulf %363, %367 : vector<8x32xf32>
    %cst_92 = arith.constant dense<0.000000e+00> : vector<8x128xf32>
    %369 = tpu.matmul %312, %2, %cst_92 {dimension_numbers = #tpu.dot_dimension_numbers<[1], [0], [0], [1], [0, 0, 1, 1], [], []>} : vector<8x32xf32>, vector<32x128xf32>, vector<8x128xf32> -> vector<8x128xf32>
    %370 = arith.addf %369, %8 : vector<8x128xf32>
    %cst_93 = arith.constant dense<0.000000e+00> : vector<8x128xf32>
    %371 = tpu.matmul %331, %3, %cst_93 {dimension_numbers = #tpu.dot_dimension_numbers<[1], [0], [0], [1], [0, 0, 1, 1], [], []>} : vector<8x32xf32>, vector<32x128xf32>, vector<8x128xf32> -> vector<8x128xf32>
    %372 = arith.addf %370, %371 : vector<8x128xf32>
    %373 = arith.mulf %372, %14 : vector<8x128xf32>
    %374 = math.tanh %373 : vector<8x128xf32>
    %cst_94 = arith.constant 5.000000e-01 : f32
    %375 = vector.broadcast %cst_94 : f32 to vector<8x128xf32>
    %376 = arith.mulf %375, %374 : vector<8x128xf32>
    %cst_95 = arith.constant 5.000000e-01 : f32
    %377 = vector.broadcast %cst_95 : f32 to vector<8x128xf32>
    %378 = arith.addf %376, %377 : vector<8x128xf32>
    %379 = vector.extract_strided_slice %378 {offsets = [0, 0], sizes = [8, 32], strides = [1, 1]} : vector<8x128xf32> to vector<8x32xf32>
    %380 = vector.extract_strided_slice %378 {offsets = [0, 32], sizes = [8, 32], strides = [1, 1]} : vector<8x128xf32> to vector<8x32xf32>
    %381 = vector.extract_strided_slice %374 {offsets = [0, 64], sizes = [8, 32], strides = [1, 1]} : vector<8x128xf32> to vector<8x32xf32>
    %382 = vector.extract_strided_slice %378 {offsets = [0, 96], sizes = [8, 32], strides = [1, 1]} : vector<8x128xf32> to vector<8x32xf32>
    %383 = arith.mulf %380, %329 : vector<8x32xf32>
    %384 = arith.mulf %379, %381 : vector<8x32xf32>
    %385 = arith.addf %383, %384 : vector<8x32xf32>
    %386 = math.tanh %385 : vector<8x32xf32>
    %387 = arith.mulf %382, %386 : vector<8x32xf32>
    %cst_96 = arith.constant dense<0.000000e+00> : vector<8x128xf32>
    %388 = tpu.matmul %331, %4, %cst_96 {dimension_numbers = #tpu.dot_dimension_numbers<[1], [0], [0], [1], [0, 0, 1, 1], [], []>} : vector<8x32xf32>, vector<32x128xf32>, vector<8x128xf32> -> vector<8x128xf32>
    %389 = arith.addf %388, %11 : vector<8x128xf32>
    %cst_97 = arith.constant dense<0.000000e+00> : vector<8x128xf32>
    %390 = tpu.matmul %350, %5, %cst_97 {dimension_numbers = #tpu.dot_dimension_numbers<[1], [0], [0], [1], [0, 0, 1, 1], [], []>} : vector<8x32xf32>, vector<32x128xf32>, vector<8x128xf32> -> vector<8x128xf32>
    %391 = arith.addf %389, %390 : vector<8x128xf32>
    %392 = arith.mulf %391, %14 : vector<8x128xf32>
    %393 = math.tanh %392 : vector<8x128xf32>
    %cst_98 = arith.constant 5.000000e-01 : f32
    %394 = vector.broadcast %cst_98 : f32 to vector<8x128xf32>
    %395 = arith.mulf %394, %393 : vector<8x128xf32>
    %cst_99 = arith.constant 5.000000e-01 : f32
    %396 = vector.broadcast %cst_99 : f32 to vector<8x128xf32>
    %397 = arith.addf %395, %396 : vector<8x128xf32>
    %398 = vector.extract_strided_slice %397 {offsets = [0, 0], sizes = [8, 32], strides = [1, 1]} : vector<8x128xf32> to vector<8x32xf32>
    %399 = vector.extract_strided_slice %397 {offsets = [0, 32], sizes = [8, 32], strides = [1, 1]} : vector<8x128xf32> to vector<8x32xf32>
    %400 = vector.extract_strided_slice %393 {offsets = [0, 64], sizes = [8, 32], strides = [1, 1]} : vector<8x128xf32> to vector<8x32xf32>
    %401 = vector.extract_strided_slice %397 {offsets = [0, 96], sizes = [8, 32], strides = [1, 1]} : vector<8x128xf32> to vector<8x32xf32>
    %402 = arith.mulf %399, %348 : vector<8x32xf32>
    %403 = arith.mulf %398, %400 : vector<8x32xf32>
    %404 = arith.addf %402, %403 : vector<8x32xf32>
    %405 = math.tanh %404 : vector<8x32xf32>
    %406 = arith.mulf %401, %405 : vector<8x32xf32>
    %cst_100 = arith.constant dense<0.000000e+00> : vector<8x128xf32>
    %407 = tpu.matmul %368, %2, %cst_100 {dimension_numbers = #tpu.dot_dimension_numbers<[1], [0], [0], [1], [0, 0, 1, 1], [], []>} : vector<8x32xf32>, vector<32x128xf32>, vector<8x128xf32> -> vector<8x128xf32>
    %408 = arith.addf %407, %8 : vector<8x128xf32>
    %cst_101 = arith.constant dense<0.000000e+00> : vector<8x128xf32>
    %409 = tpu.matmul %387, %3, %cst_101 {dimension_numbers = #tpu.dot_dimension_numbers<[1], [0], [0], [1], [0, 0, 1, 1], [], []>} : vector<8x32xf32>, vector<32x128xf32>, vector<8x128xf32> -> vector<8x128xf32>
    %410 = arith.addf %408, %409 : vector<8x128xf32>
    %411 = arith.mulf %410, %14 : vector<8x128xf32>
    %412 = math.tanh %411 : vector<8x128xf32>
    %cst_102 = arith.constant 5.000000e-01 : f32
    %413 = vector.broadcast %cst_102 : f32 to vector<8x128xf32>
    %414 = arith.mulf %413, %412 : vector<8x128xf32>
    %cst_103 = arith.constant 5.000000e-01 : f32
    %415 = vector.broadcast %cst_103 : f32 to vector<8x128xf32>
    %416 = arith.addf %414, %415 : vector<8x128xf32>
    %417 = vector.extract_strided_slice %416 {offsets = [0, 0], sizes = [8, 32], strides = [1, 1]} : vector<8x128xf32> to vector<8x32xf32>
    %418 = vector.extract_strided_slice %416 {offsets = [0, 32], sizes = [8, 32], strides = [1, 1]} : vector<8x128xf32> to vector<8x32xf32>
    %419 = vector.extract_strided_slice %412 {offsets = [0, 64], sizes = [8, 32], strides = [1, 1]} : vector<8x128xf32> to vector<8x32xf32>
    %420 = vector.extract_strided_slice %416 {offsets = [0, 96], sizes = [8, 32], strides = [1, 1]} : vector<8x128xf32> to vector<8x32xf32>
    %421 = arith.mulf %418, %385 : vector<8x32xf32>
    %422 = arith.mulf %417, %419 : vector<8x32xf32>
    %423 = arith.addf %421, %422 : vector<8x32xf32>
    %424 = math.tanh %423 : vector<8x32xf32>
    %425 = arith.mulf %420, %424 : vector<8x32xf32>
    %cst_104 = arith.constant dense<0.000000e+00> : vector<8x128xf32>
    %426 = tpu.matmul %387, %4, %cst_104 {dimension_numbers = #tpu.dot_dimension_numbers<[1], [0], [0], [1], [0, 0, 1, 1], [], []>} : vector<8x32xf32>, vector<32x128xf32>, vector<8x128xf32> -> vector<8x128xf32>
    %427 = arith.addf %426, %11 : vector<8x128xf32>
    %cst_105 = arith.constant dense<0.000000e+00> : vector<8x128xf32>
    %428 = tpu.matmul %406, %5, %cst_105 {dimension_numbers = #tpu.dot_dimension_numbers<[1], [0], [0], [1], [0, 0, 1, 1], [], []>} : vector<8x32xf32>, vector<32x128xf32>, vector<8x128xf32> -> vector<8x128xf32>
    %429 = arith.addf %427, %428 : vector<8x128xf32>
    %430 = arith.mulf %429, %14 : vector<8x128xf32>
    %431 = math.tanh %430 : vector<8x128xf32>
    %cst_106 = arith.constant 5.000000e-01 : f32
    %432 = vector.broadcast %cst_106 : f32 to vector<8x128xf32>
    %433 = arith.mulf %432, %431 : vector<8x128xf32>
    %cst_107 = arith.constant 5.000000e-01 : f32
    %434 = vector.broadcast %cst_107 : f32 to vector<8x128xf32>
    %435 = arith.addf %433, %434 : vector<8x128xf32>
    %436 = vector.extract_strided_slice %435 {offsets = [0, 0], sizes = [8, 32], strides = [1, 1]} : vector<8x128xf32> to vector<8x32xf32>
    %437 = vector.extract_strided_slice %435 {offsets = [0, 32], sizes = [8, 32], strides = [1, 1]} : vector<8x128xf32> to vector<8x32xf32>
    %438 = vector.extract_strided_slice %431 {offsets = [0, 64], sizes = [8, 32], strides = [1, 1]} : vector<8x128xf32> to vector<8x32xf32>
    %439 = vector.extract_strided_slice %435 {offsets = [0, 96], sizes = [8, 32], strides = [1, 1]} : vector<8x128xf32> to vector<8x32xf32>
    %440 = arith.mulf %437, %404 : vector<8x32xf32>
    %441 = arith.mulf %436, %438 : vector<8x32xf32>
    %442 = arith.addf %440, %441 : vector<8x32xf32>
    %443 = math.tanh %442 : vector<8x32xf32>
    %444 = arith.mulf %439, %443 : vector<8x32xf32>
    %cst_108 = arith.constant dense<0.000000e+00> : vector<8x128xf32>
    %445 = tpu.matmul %425, %4, %cst_108 {dimension_numbers = #tpu.dot_dimension_numbers<[1], [0], [0], [1], [0, 0, 1, 1], [], []>} : vector<8x32xf32>, vector<32x128xf32>, vector<8x128xf32> -> vector<8x128xf32>
    %446 = arith.addf %445, %11 : vector<8x128xf32>
    %cst_109 = arith.constant dense<0.000000e+00> : vector<8x128xf32>
    %447 = tpu.matmul %444, %5, %cst_109 {dimension_numbers = #tpu.dot_dimension_numbers<[1], [0], [0], [1], [0, 0, 1, 1], [], []>} : vector<8x32xf32>, vector<32x128xf32>, vector<8x128xf32> -> vector<8x128xf32>
    %448 = arith.addf %446, %447 : vector<8x128xf32>
    %449 = arith.mulf %448, %14 : vector<8x128xf32>
    %450 = math.tanh %449 : vector<8x128xf32>
    %cst_110 = arith.constant 5.000000e-01 : f32
    %451 = vector.broadcast %cst_110 : f32 to vector<8x128xf32>
    %452 = arith.mulf %451, %450 : vector<8x128xf32>
    %cst_111 = arith.constant 5.000000e-01 : f32
    %453 = vector.broadcast %cst_111 : f32 to vector<8x128xf32>
    %454 = arith.addf %452, %453 : vector<8x128xf32>
    %455 = vector.extract_strided_slice %454 {offsets = [0, 0], sizes = [8, 32], strides = [1, 1]} : vector<8x128xf32> to vector<8x32xf32>
    %456 = vector.extract_strided_slice %454 {offsets = [0, 32], sizes = [8, 32], strides = [1, 1]} : vector<8x128xf32> to vector<8x32xf32>
    %457 = vector.extract_strided_slice %450 {offsets = [0, 64], sizes = [8, 32], strides = [1, 1]} : vector<8x128xf32> to vector<8x32xf32>
    %458 = vector.extract_strided_slice %454 {offsets = [0, 96], sizes = [8, 32], strides = [1, 1]} : vector<8x128xf32> to vector<8x32xf32>
    %459 = arith.mulf %456, %442 : vector<8x32xf32>
    %460 = arith.mulf %455, %457 : vector<8x32xf32>
    %461 = arith.addf %459, %460 : vector<8x32xf32>
    %462 = math.tanh %461 : vector<8x32xf32>
    %463 = arith.mulf %458, %462 : vector<8x32xf32>
    %c192 = arith.constant 192 : index
    %c0_112 = arith.constant 0 : index
    %464 = vector.load %arg1[%c192, %c0_112] : memref<240x128xf32, #tpu.memory_space<vmem>>, vector<32x128xf32>
    %cst_113 = arith.constant dense<0.000000e+00> : vector<8x128xf32>
    %465 = tpu.matmul %463, %464, %cst_113 {dimension_numbers = #tpu.dot_dimension_numbers<[1], [0], [0], [1], [0, 0, 1, 1], [], []>} : vector<8x32xf32>, vector<32x128xf32>, vector<8x128xf32> -> vector<8x128xf32>
    %c224 = arith.constant 224 : index
    %c0_114 = arith.constant 0 : index
    %466 = vector.load %arg1[%c224, %c0_114] : memref<240x128xf32, #tpu.memory_space<vmem>>, vector<1x128xf32>
    %467 = vector.broadcast %466 : vector<1x128xf32> to vector<8x128xf32>
    %468 = arith.addf %465, %467 : vector<8x128xf32>
    %c0_115 = arith.constant 0 : index
    %c0_116 = arith.constant 0 : index
    %469 = vector.load %arg2[%c0_115, %c0_116] : memref<8x128xf32, #tpu.memory_space<vmem>>, vector<8x128xf32>
    tpu.vector_store %arg2[%c0_115, %c0_116], %468 {strides = array<i32>} : memref<8x128xf32, #tpu.memory_space<vmem>>, vector<8x128xf32>,
    return
  }
}

</mosaic_0001>

<bundles_post_ra>
// kernel: tpu_custom_call.1
= control target key start
LH: loop header
LB: loop body
LE: loop exit
PB: predicated region body
PF: predicated region fallthrough
CT: control target
= control target key end

     0   :  { %7 = vsyncpa [#allocation4], 0  ;;  %s5187_s0 = inlined_call_operand.vmem [shape: f32[64,8], index: 0, kind: input, shape index: {}]   ;;  %s5188_s1 = inlined_call_operand.hbm [shape: f32[240,128], index: 1, kind: input, shape index: {}]   ;;  %s5189_s2 = inlined_call_operand.hbm [shape: f32[8,128], index: 2, kind: output, shape index: {}]  }
   0x1   :  { %8 = vsyncpa [#allocation5], 0  ;;  %s4406_s9 = smov [#allocation3]  }
   0x2   :  { %s16_s10 = sshll.u32 %s4406_s9, 4  ;;  %s17_s10 = int_to_ptr.vmem [resolvable:$true] %s16_s10 }
   0x3   :  { %s4370_s11 = scalar_lea.vmem %s17_s10, 3840  ;;  %p4375_p1 = scmp.lt.s32.totalorder %s17_s10, %s17_s10 }
   0x4   :  { %p4371_p0 = scmp.ne.s32.totalorder %s17_s10, %s4370_s11  ;;  %p4376_p2 = scmp.lt.s32.totalorder %s4370_s11, %s4370_s11 }
   0x6   :  { %p4377_p3 = por %p4376_p2, %p4375_p1 }
   0x8   :  { %p4378_p4 = pnand %p4377_p3, %p4371_p0 }
   0xa   :  { %4381 = shalt.err (!%p4378_p4)
}
   0xb   :  { %s4407_s12 = smov 128   ;;  %s4408_s13 = smov 8  }
   0xc   :  { %22 = dma.hbm_to_vmem [thread:$0]  %s5188_s1, 3840, %s17_s10, [#allocation4], %s4407_s12, %s4407_s12, %s4408_s13  }
   0xd   :  { %4402 = dma.done.wait [#allocation4], 3840  }
   0xe   :  { %4403 = vsyncadd [#allocation4], 4294963456  ;;  %vm75_vm0 = vcmask 64512   ;;  %v26_v0 = vld [vmem:[#allocation3] sm:$0xff]  ;;  %v63_v2 = vld [vmem:[%s5187_s0 + $0x8] sm:$0xff]  ;;  %s4409_s1 = smov 64  }
   0xf   :  { %v62_v1 = vld [vmem:[%s5187_s0] sm:$0xff]  ;;  %3802 = vmatprep.subr.mxu0 %v26_v0  ;;  %v4442_v4 = vld [vmem:[#allocation3 + $0x28] ss:$0 sm:$0xff]  ;;  %s4410_s20 = smov 32   ;;  %v4411_v18 = vmov 0.0   ;;  %v4456_v19 = vld [vmem:[#allocation3 + $0x18] sm:$0xff] }
  0x10   :  { %3804 = vmatprep.mubr.msk.f32.mxu0 %vm75_vm0, %v62_v1  ;;  %3803 = vmatpush3.msra.mxu0 %v26_v0  ;;  %v4444_v5 = vld [vmem:[#allocation3 + $0xe8] ss:$0 sm:$0xff]  ;;  %v4453_v17 = vld [vmem:[#allocation3 + $0x20] sm:$0xff]  ;;  %vm4412_vm1 = vmmov 0   ;;  %v4463_v20 = vld [vmem:[#allocation3 + $0x10] sm:$0xff]  ;;  %vm239_vm2 = vcmask 261120  }
  0x11   :  { %3805 = vmatmul.mubr.msk.f32.vlgmr.msra.gmra.mxu0 %vm75_vm0, %v63_v2  ;;  %3816 = vmatprep.subr.mxu1 %v4411_v18  ;;  %v4469_v21 = vld [vmem:[#allocation3 + $0x8] sm:$0xff]  ;;  %v4486_v27 = vld [vmem:[#allocation3 + $0x40] sm:$0xff]  ;;  %v4492_v28 = vld [vmem:[#allocation3 + $0x38] sm:$0xff] }
  0x12   :  { %3824 = vmatprep.mubr.msk.f32.mxu1 %vm4412_vm1, %v4411_v18  ;;  %3817 = vmatpush3.msra.mxu1 %v4453_v17  ;;  %v4483_v25 = vld [vmem:[#allocation3 + $0x48] sm:$0xff]  ;;  %v4496_v29 = vld [vmem:[#allocation3 + $0x30] sm:$0xff]  ;;  %v65_v57 = vld [vmem:[%s5187_s0 + $0x18] sm:$0xff] }
  0x13   :  { %3838 = vmatprep.subr.mxu0 %v4411_v18  ;;  %3818 = vmatprep.subr.mxu1 %v4411_v18  ;;  %v4516_v35 = vld [vmem:[#allocation3 + $0x70] ss:$0 sm:$0xff]  ;;  %v66_v58 = vld [vmem:[%s5187_s0 + $0x20] sm:$0xff]  ;;  %v67_v60 = vld [vmem:[%s5187_s0 + $0x28] sm:$0xff] }
  0x14   :  { %3839 = vmatpush3.msra.mxu0 %v4453_v17  ;;  %3819 = vmatpush3.msra.mxu1 %v4456_v19  ;;  %v64_v56 = vld [vmem:[%s5187_s0 + $0x10] sm:$0xff]  ;;  %v69_v62 = vld [vmem:[%s5187_s0 + $0x38] sm:$0xff] }
  0x15   :  { %3840 = vmatprep.subr.mxu0 %v4411_v18  ;;  %3820 = vmatprep.subr.mxu1 %v4411_v18  ;;  %v68_v61 = vld [vmem:[%s5187_s0 + $0x30] sm:$0xff]  ;;  %s4413_s0 = smov [#allocation6]  }
  0x16   :  { %3841 = vmatpush3.msra.mxu0 %v4456_v19  ;;  %3821 = vmatpush3.msra.mxu1 %v4463_v20  ;;  %s3543_s5 = sshll.u32 %s4413_s0, 4  ;;  %s3544_s5 = int_to_ptr.vmem [resolvable:$true] %s3543_s5 }
  0x17   :  { %3842 = vmatprep.subr.mxu0 %v4411_v18  ;;  %3822 = vmatprep.subr.mxu1 %v4411_v18  ;;  %s4382_s6 = scalar_lea.vmem %s3544_s5, 128  ;;  %p4387_p6 = scmp.lt.s32.totalorder %s3544_s5, %s3544_s5 }
  0x18   :  { %3843 = vmatpush3.msra.mxu0 %v4463_v20  ;;  %3823 = vmatpush3.msra.mxu1 %v4469_v21  ;;  %p4383_p5 = scmp.ne.s32.totalorder %s3544_s5, %s4382_s6  ;;  %p4388_p7 = scmp.lt.s32.totalorder %s4382_s6, %s4382_s6 }
  0x19   :  { %3844 = vmatprep.subr.mxu0 %v4411_v18  ;;  %3827 = vmatprep.subr.mxu1 %v4411_v18 }
  0x1a   :  { %3845 = vmatpush3.msra.mxu0 %v4469_v21  ;;  %3807 = vmatprep.mubr.msk.f32.mxu0 %vm75_vm0, %v64_v56  ;;  %p4389_p8 = por %p4388_p7, %p4387_p6 }
  0x1b   :  { %3860 = vmatprep.subr.mxu0 %v4411_v18  ;;  %3808 = vmatmul.mubr.msk.f32.gmra.mxu0 %vm75_vm0, %v65_v57 }
  0x1c   :  { %3810 = vmatprep.mubr.msk.f32.mxu0 %vm75_vm0, %v66_v58  ;;  %p4390_p9 = pnand %p4389_p8, %p4383_p5 }
  0x1f   :  { %3811 = vmatmul.mubr.msk.f32.gmra.mxu0 %vm75_vm0, %v67_v60 }
  0x20   :  { %3813 = vmatprep.mubr.msk.f32.mxu0 %vm75_vm0, %v68_v61 }
  0x23   :  { %3814 = vmatmul.mubr.msk.f32.gmra.mxu0 %vm75_vm0, %v69_v62 }
  0x24   :  { %3846 = vmatprep.mubr.msk.f32.mxu0 %vm4412_vm1, %v4411_v18 }
  0xd1   :  { %v4440_v3 = vpop.f32.mrf.mxu0 }
  0xd2   :  { %v172_v30 = vadd.f32 %v4440_v3, %v4442_v4 }
  0xd3   :  { %v166_v6 = vpop.f32.mrf.mxu0 }
  0xd4   :  { %v167_v7 = vadd.f32 %v4442_v4, %v166_v6  ;;  %v4561_v6 = vld [vmem:[#allocation3 + $0x68] sm:$0xff] }
  0xd6   :  { %v214_v8 = vmul.f32 %v4444_v5, %v167_v7  ;;  %v4563_v7 = vld [vmem:[#allocation3 + $0x90] sm:$0xff] }
  0xd8   :  { %4242 = vtanh.f32 %v214_v8 }
  0xe5   :  { %v4243_v9 = vpop.eup %4242 }
  0xe6   :  { %220 = vrot.lane.b32.xlu0 %v4243_v9, %s4409_s1  ;;  %v216_v10 = vmul.f32 0.5, %v4243_v9  ;;  %v4567_v9 = vld [vmem:[#allocation3 + $0x60] sm:$0xff] }
  0xe8   :  { %v217_v11 = vadd.f32 0.5, %v216_v10  ;;  %v4569_v10 = vld [vmem:[#allocation3 + $0x88] sm:$0xff] }
  0xea   :  { %v218_v14 = vmul.f32 0.0, %v217_v11 }
 0x158   :  { %v221_v12 = vpop.permute.xlu0 %220 }
 0x159   :  { %v223_v13 = vmul.f32 %v221_v12, %v217_v11  ;;  %v4577_v12 = vld [vmem:[#allocation3 + $0x80] sm:$0xff] }
 0x15b   :  { %225 = vrot.lane.b32.xlu0 %v223_v13, %s4410_s20  ;;  %v4583_v13 = vld [vmem:[#allocation3 + $0x50] sm:$0xff] }
 0x1cd   :  { %v226_v15 = vpop.permute.xlu0 %225 }
 0x1ce   :  { %v4450_v16 = vadd.f32 %v226_v15, %v218_v14  ;;  %v4587_v14 = vld [vmem:[#allocation3 + $0x78] sm:$0xff] }
 0x1d0   :  { %4244 = vtanh.f32 %v4450_v16 }
 0x1dd   :  { %v4245_v22 = vpop.eup %4244 }
 0x1de   :  { %231 = vrot.lane.b32.xlu1 %v4245_v22, %s4409_s1 }
 0x250   :  { %v232_v23 = vpop.permute.xlu1 %231 }
 0x251   :  { %v234_v24 = vmul.f32 %v232_v23, %v217_v11  ;;  %v4575_v11 = vld [vmem:[#allocation3 + $0x58] sm:$0xff] }
 0x253   :  { %237 = vrot.lane.b32.xlu1 %v234_v24, %s4410_s20 }
 0x2c5   :  { %v238_v26 = vpop.permute.xlu1 %237 }
 0x2c6   :  { %3825 = vmatmul.mubr.msk.f32.vlgmr.msra.gmra.mxu1 %vm239_vm2, %v238_v26 }
 0x2c7   :  { %3828 = vmatpush3.msra.mxu1 %v4483_v25  ;;  %3835 = vmatprep.mubr.msk.f32.mxu1 %vm4412_vm1, %v4411_v18 }
 0x2c8   :  { %3829 = vmatprep.subr.mxu1 %v4411_v18 }
 0x2c9   :  { %3830 = vmatpush3.msra.mxu1 %v4486_v27 }
 0x2ca   :  { %3831 = vmatprep.subr.mxu1 %v4411_v18 }
 0x2cb   :  { %3832 = vmatpush3.msra.mxu1 %v4492_v28 }
 0x2cc   :  { %3833 = vmatprep.subr.mxu1 %v4411_v18 }
 0x2cd   :  { %3834 = vmatpush3.msra.mxu1 %v4496_v29 }
 0x2ce   :  { %3836 = vmatmul.mubr.msk.f32.vlgmr.msra.gmra.mxu1 %vm239_vm2, %v238_v26  ;;  %3849 = vmatprep.subr.mxu1 %v4411_v18 }
 0x2cf   :  { %3850 = vmatpush3.msra.mxu1 %v4483_v25  ;;  %3857 = vmatprep.mubr.msk.f32.mxu1 %vm4412_vm1, %v4411_v18 }
 0x2d0   :  { %3851 = vmatprep.subr.mxu1 %v4411_v18 }
 0x2d1   :  { %3852 = vmatpush3.msra.mxu1 %v4486_v27 }
 0x2d2   :  { %3853 = vmatprep.subr.mxu1 %v4411_v18 }
 0x2d3   :  { %3854 = vmatpush3.msra.mxu1 %v4492_v28 }
 0x2d4   :  { %3855 = vmatprep.subr.mxu1 %v4411_v18 }
 0x2d5   :  { %3856 = vmatpush3.msra.mxu1 %v4496_v29 }
 0x2d6   :  { %3871 = vmatprep.subr.mxu1 %v4411_v18 }
 0x386   :  { %v308_v31 = vpop.f32.mrf.mxu1 }
 0x387   :  { %v312_v32 = vadd.f32 %v308_v31, %v172_v30 }
 0x388   :  { %v3826_v33 = vpop.f32.mrf.mxu1 }
 0x389   :  { %v313_v34 = vmul.f32 %v4444_v5, %v312_v32 }
 0x38b   :  { %4246 = vtanh.f32 %v313_v34 }
 0x38e   :  { %v400_v36 = vpop.f32.mrf.mxu1 }
 0x38f   :  { %v401_v37 = vadd.f32 %v4516_v35, %v400_v36 }
 0x390   :  { %v3837_v38 = vpop.f32.mrf.mxu1 }
 0x391   :  { %v404_v39 = vmul.f32 %v4444_v5, %v401_v37 }
 0x393   :  { %4248 = vtanh.f32 %v404_v39  ;;  %v4633_v39 = vld [vmem:[#allocation3 + $0xb8] ss:$0 sm:$0xff] }
 0x398   :  { %v4247_v40 = vpop.eup %4246 }
 0x399   :  { %319 = vrot.lane.b32.xlu0 %v4247_v40, %s4409_s1  ;;  %v315_v42 = vmul.f32 0.5, %v4247_v40 }
 0x39b   :  { %v316_v43 = vadd.f32 0.5, %v315_v42 }
 0x39d   :  { %v317_v50 = vmul.f32 %v316_v43, %v4450_v16  ;;  %v4621_v16 = vpop.f32.mrf.mxu0 }
 0x39f   :  { %v176_v22 = vpop.f32.mrf.mxu0 }
 0x3a0   :  { %v4249_v41 = vpop.eup %4248  ;;  %v177_v31 = vadd.f32 %v4442_v4, %v176_v22 }
 0x3a1   :  { %410 = vrot.lane.b32.xlu1 %v4249_v41, %s4409_s1  ;;  %v406_v46 = vmul.f32 0.5, %v4249_v41  ;;  %v4623_v23 = vpop.f32.mrf.mxu0 }
 0x3a3   :  { %v407_v47 = vadd.f32 0.5, %v406_v46  ;;  %v4625_v24 = vpop.f32.mrf.mxu0 }
 0x3a5   :  { %v408_v53 = vmul.f32 0.0, %v407_v47  ;;  %v4627_v26 = vpop.f32.mrf.mxu0 }
 0x3a7   :  { %v4629_v30 = vpop.f32.mrf.mxu0 }
 0x40b   :  { %v320_v44 = vpop.permute.xlu0 %319 }
 0x40c   :  { %v322_v45 = vmul.f32 %v320_v44, %v316_v43 }
 0x40e   :  { %324 = vrot.lane.b32.xlu0 %v322_v45, %s4410_s20 }
 0x413   :  { %v411_v48 = vpop.permute.xlu1 %410 }
 0x414   :  { %v413_v49 = vmul.f32 %v411_v48, %v407_v47 }
 0x416   :  { %415 = vrot.lane.b32.xlu1 %v413_v49, %s4410_s20 }
 0x480   :  { %v325_v51 = vpop.permute.xlu0 %324 }
 0x481   :  { %v4525_v52 = vadd.f32 %v325_v51, %v317_v50 }
 0x483   :  { %4250 = vtanh.f32 %v4525_v52 }
 0x488   :  { %v416_v54 = vpop.permute.xlu1 %415 }
 0x489   :  { %v4528_v55 = vadd.f32 %v416_v54, %v408_v53 }
 0x48b   :  { %4252 = vtanh.f32 %v4528_v55 }
 0x490   :  { %v4251_v59 = vpop.eup %4250 }
 0x491   :  { %330 = vrot.lane.b32.xlu0 %v4251_v59, %s4409_s1 }
 0x498   :  { %v4253_v63 = vpop.eup %4252 }
 0x499   :  { %421 = vrot.lane.b32.xlu1 %v4253_v63, %s4409_s1 }
 0x503   :  { %v331_v0 = vpop.permute.xlu0 %330 }
 0x504   :  { %v333_v1 = vmul.f32 %v331_v0, %v316_v43 }
 0x506   :  { %427 = vrot.lane.b32.xlu0 %v333_v1, %s4410_s20 }
 0x50b   :  { %v422_v2 = vpop.permute.xlu1 %421 }
 0x50c   :  { %v424_v3 = vmul.f32 %v422_v2, %v407_v47 }
 0x50e   :  { %594 = vrot.lane.b32.xlu1 %v424_v3, %s4410_s20 }
 0x578   :  { %v428_v8 = vpop.permute.xlu0 %427 }
 0x579   :  { %3847 = vmatmul.mubr.msk.f32.vlgmr.msra.gmra.mxu0 %vm239_vm2, %v428_v8  ;;  %3858 = vmatmul.mubr.msk.f32.vlgmr.msra.gmra.mxu1 %vm239_vm2, %v428_v8 }
 0x57a   :  { %3861 = vmatpush3.msra.mxu0 %v4561_v6  ;;  %3872 = vmatpush3.msra.mxu1 %v4563_v7 }
 0x57b   :  { %3862 = vmatprep.subr.mxu0 %v4411_v18  ;;  %3873 = vmatprep.subr.mxu1 %v4411_v18 }
 0x57c   :  { %3863 = vmatpush3.msra.mxu0 %v4567_v9  ;;  %3874 = vmatpush3.msra.mxu1 %v4569_v10 }
 0x57d   :  { %3864 = vmatprep.subr.mxu0 %v4411_v18  ;;  %3875 = vmatprep.subr.mxu1 %v4411_v18 }
 0x57e   :  { %3865 = vmatpush3.msra.mxu0 %v4575_v11  ;;  %3876 = vmatpush3.msra.mxu1 %v4577_v12 }
 0x57f   :  { %3866 = vmatprep.subr.mxu0 %v4411_v18  ;;  %3877 = vmatprep.subr.mxu1 %v4411_v18 }
 0x580   :  { %3867 = vmatpush3.msra.mxu0 %v4583_v13  ;;  %3868 = vmatprep.mubr.msk.f32.mxu0 %vm4412_vm1, %v4411_v18  ;;  %v595_v15 = vpop.permute.xlu1 %594 }
 0x581   :  { %3878 = vmatpush3.msra.mxu1 %v4587_v14  ;;  %3879 = vmatprep.mubr.msk.f32.mxu1 %vm4412_vm1, %v4411_v18 }
 0x582   :  { %3869 = vmatmul.mubr.msk.f32.vlgmr.msra.gmra.mxu0 %vm239_vm2, %v595_v15  ;;  %3880 = vmatmul.mubr.msk.f32.vlgmr.msra.gmra.mxu1 %vm239_vm2, %v595_v15 }
 0x583   :  { %3882 = vmatprep.subr.mxu0 %v4411_v18  ;;  %3893 = vmatprep.subr.mxu1 %v4411_v18 }
 0x584   :  { %3883 = vmatpush3.msra.mxu0 %v4453_v17  ;;  %3894 = vmatpush3.msra.mxu1 %v4483_v25 }
 0x585   :  { %3884 = vmatprep.subr.mxu0 %v4411_v18  ;;  %3895 = vmatprep.subr.mxu1 %v4411_v18 }
 0x586   :  { %3885 = vmatpush3.msra.mxu0 %v4456_v19  ;;  %3896 = vmatpush3.msra.mxu1 %v4486_v27 }
 0x587   :  { %3886 = vmatprep.subr.mxu0 %v4411_v18  ;;  %3897 = vmatprep.subr.mxu1 %v4411_v18 }
 0x588   :  { %3887 = vmatpush3.msra.mxu0 %v4463_v20  ;;  %3898 = vmatpush3.msra.mxu1 %v4492_v28 }
 0x589   :  { %3888 = vmatprep.subr.mxu0 %v4411_v18  ;;  %3899 = vmatprep.subr.mxu1 %v4411_v18 }
 0x58a   :  { %3889 = vmatpush3.msra.mxu0 %v4469_v21  ;;  %3900 = vmatpush3.msra.mxu1 %v4496_v29 }
 0x58b   :  { %3890 = vmatprep.mubr.msk.f32.mxu0 %vm4412_vm1, %v4411_v18  ;;  %3901 = vmatprep.mubr.msk.f32.mxu1 %vm4412_vm1, %v4411_v18 }
 0x58c   :  { %3904 = vmatprep.subr.mxu0 %v4411_v18  ;;  %3915 = vmatprep.subr.mxu1 %v4411_v18 }
 0x639   :  { %v497_v32 = vpop.f32.mrf.mxu0  ;;  %v589_v33 = vpop.f32.mrf.mxu1 }
 0x63a   :  { %v501_v34 = vadd.f32 %v497_v32, %v177_v31  ;;  %v590_v40 = vadd.f32 %v4516_v35, %v589_v33 }
 0x63b   :  { %v3848_v36 = vpop.f32.mrf.mxu0  ;;  %v3859_v37 = vpop.f32.mrf.mxu1 }
 0x63c   :  { %v502_v38 = vmul.f32 %v4444_v5, %v501_v34 }
 0x63e   :  { %4254 = vtanh.f32 %v502_v38 }
 0x642   :  { %v664_v41 = vpop.f32.mrf.mxu0  ;;  %v756_v42 = vpop.f32.mrf.mxu1 }
 0x643   :  { %v668_v43 = vadd.f32 %v664_v41, %v590_v40  ;;  %v757_v44 = vadd.f32 %v4633_v39, %v756_v42 }
 0x644   :  { %v3870_v45 = vpop.f32.mrf.mxu0  ;;  %v3881_v46 = vpop.f32.mrf.mxu1 }
 0x645   :  { %v669_v47 = vmul.f32 %v4444_v5, %v668_v43  ;;  %v760_v48 = vmul.f32 %v4444_v5, %v757_v44  ;;  %v4682_v46 = vld [vmem:[#allocation3 + $0xb0] sm:$0xff] }
 0x647   :  { %4256 = vtanh.f32 %v669_v47  ;;  %v4687_v47 = vld [vmem:[#allocation3 + $0xa8] sm:$0xff] }
 0x648   :  { %4258 = vtanh.f32 %v760_v48  ;;  %v4694_v48 = vld [vmem:[#allocation3 + $0xa0] sm:$0xff] }
 0x64b   :  { %v4255_v49 = vpop.eup %4254 }
 0x64c   :  { %508 = vrot.lane.b32.xlu0 %v4255_v49, %s4409_s1  ;;  %v504_v53 = vmul.f32 0.5, %v4255_v49  ;;  %v4700_v49 = vld [vmem:[#allocation3 + $0x98] sm:$0xff] }
 0x64e   :  { %v505_v54 = vadd.f32 0.5, %v504_v53 }
 0x650   :  { %v506_v2 = vmul.f32 %v505_v54, %v4525_v52 }
 0x654   :  { %v4257_v50 = vpop.eup %4256 }
 0x655   :  { %v4259_v51 = vpop.eup %4258  ;;  %675 = vrot.lane.b32.xlu1 %v4257_v50, %s4409_s1  ;;  %v671_v58 = vmul.f32 0.5, %v4257_v50 }
 0x656   :  { %766 = vrot.lane.b32.xlu0 %v4259_v51, %s4409_s1  ;;  %v762_v59 = vmul.f32 0.5, %v4259_v51  ;;  %v182_v51 = vadd.f32 %v4621_v16, %v4442_v4 }
 0x657   :  { %v672_v60 = vadd.f32 0.5, %v671_v58 }
 0x658   :  { %v763_v62 = vadd.f32 0.5, %v762_v59 }
 0x659   :  { %v673_v15 = vmul.f32 %v672_v60, %v4528_v55 }
 0x65a   :  { %v764_v31 = vmul.f32 0.0, %v763_v62 }
 0x6be   :  { %v509_v56 = vpop.permute.xlu0 %508 }
 0x6bf   :  { %v511_v57 = vmul.f32 %v509_v56, %v505_v54 }
 0x6c1   :  { %513 = vrot.lane.b32.xlu1 %v511_v57, %s4410_s20 }
 0x6c7   :  { %v676_v61 = vpop.permute.xlu1 %675 }
 0x6c8   :  { %v678_v63 = vmul.f32 %v676_v61, %v672_v60  ;;  %v767_v0 = vpop.permute.xlu0 %766 }
 0x6c9   :  { %v769_v1 = vmul.f32 %v767_v0, %v763_v62 }
 0x6ca   :  { %680 = vrot.lane.b32.xlu0 %v678_v63, %s4410_s20 }
 0x6cb   :  { %771 = vrot.lane.b32.xlu1 %v769_v1, %s4410_s20 }
 0x733   :  { %v514_v3 = vpop.permute.xlu1 %513 }
 0x734   :  { %v4646_v8 = vadd.f32 %v514_v3, %v506_v2 }
 0x736   :  { %4260 = vtanh.f32 %v4646_v8 }
 0x73c   :  { %v681_v22 = vpop.permute.xlu0 %680 }
 0x73d   :  { %v4650_v32 = vadd.f32 %v681_v22, %v673_v15  ;;  %v772_v33 = vpop.permute.xlu1 %771 }
 0x73e   :  { %v4652_v34 = vadd.f32 %v772_v33, %v764_v31 }
 0x73f   :  { %4262 = vtanh.f32 %v4650_v32 }
 0x740   :  { %4264 = vtanh.f32 %v4652_v34 }
 0x743   :  { %v4261_v36 = vpop.eup %4260 }
 0x744   :  { %519 = vrot.lane.b32.xlu0 %v4261_v36, %s4409_s1 }
 0x74c   :  { %v4263_v52 = vpop.eup %4262 }
 0x74d   :  { %v4265_v37 = vpop.eup %4264  ;;  %686 = vrot.lane.b32.xlu1 %v4263_v52, %s4409_s1 }
 0x74e   :  { %777 = vrot.lane.b32.xlu0 %v4265_v37, %s4409_s1 }
 0x7b6   :  { %v520_v55 = vpop.permute.xlu0 %519 }
 0x7b7   :  { %v522_v38 = vmul.f32 %v520_v55, %v505_v54 }
 0x7b9   :  { %783 = vrot.lane.b32.xlu1 %v522_v38, %s4410_s20 }
 0x7bf   :  { %v687_v40 = vpop.permute.xlu1 %686 }
 0x7c0   :  { %v689_v41 = vmul.f32 %v687_v40, %v672_v60  ;;  %v778_v42 = vpop.permute.xlu0 %777 }
 0x7c1   :  { %v780_v43 = vmul.f32 %v778_v42, %v763_v62 }
 0x7c2   :  { %950 = vrot.lane.b32.xlu0 %v689_v41, %s4410_s20 }
 0x7c3   :  { %1117 = vrot.lane.b32.xlu1 %v780_v43, %s4410_s20 }
 0x82b   :  { %v784_v44 = vpop.permute.xlu1 %783 }
 0x82c   :  { %3891 = vmatmul.mubr.msk.f32.vlgmr.msra.gmra.mxu0 %vm239_vm2, %v784_v44  ;;  %3902 = vmatmul.mubr.msk.f32.vlgmr.msra.gmra.mxu1 %vm239_vm2, %v784_v44 }
 0x82d   :  { %3905 = vmatpush3.msra.mxu0 %v4561_v6  ;;  %3916 = vmatpush3.msra.mxu1 %v4563_v7 }
 0x82e   :  { %3906 = vmatprep.subr.mxu0 %v4411_v18  ;;  %3917 = vmatprep.subr.mxu1 %v4411_v18 }
 0x82f   :  { %3907 = vmatpush3.msra.mxu0 %v4567_v9  ;;  %3918 = vmatpush3.msra.mxu1 %v4569_v10 }
 0x830   :  { %3908 = vmatprep.subr.mxu0 %v4411_v18  ;;  %3919 = vmatprep.subr.mxu1 %v4411_v18 }
 0x831   :  { %3909 = vmatpush3.msra.mxu0 %v4575_v11  ;;  %3920 = vmatpush3.msra.mxu1 %v4577_v12 }
 0x832   :  { %3910 = vmatprep.subr.mxu0 %v4411_v18  ;;  %3921 = vmatprep.subr.mxu1 %v4411_v18 }
 0x833   :  { %3911 = vmatpush3.msra.mxu0 %v4583_v13  ;;  %3912 = vmatprep.mubr.msk.f32.mxu0 %vm4412_vm1, %v4411_v18 }
 0x834   :  { %3922 = vmatpush3.msra.mxu1 %v4587_v14  ;;  %3923 = vmatprep.mubr.msk.f32.mxu1 %vm4412_vm1, %v4411_v18  ;;  %v951_v45 = vpop.permute.xlu0 %950 }
 0x835   :  { %3913 = vmatmul.mubr.msk.f32.vlgmr.msra.gmra.mxu0 %vm239_vm2, %v951_v45  ;;  %3924 = vmatmul.mubr.msk.f32.vlgmr.msra.gmra.mxu1 %vm239_vm2, %v951_v45  ;;  %v1118_v50 = vpop.permute.xlu1 %1117 }
 0x836   :  { %3926 = vmatprep.subr.mxu0 %v4411_v18  ;;  %3934 = vmatprep.mubr.msk.f32.mxu0 %vm4412_vm1, %v4411_v18 }
 0x837   :  { %3927 = vmatpush3.msra.mxu0 %v4682_v46  ;;  %3937 = vmatprep.subr.mxu1 %v4411_v18 }
 0x838   :  { %3928 = vmatprep.subr.mxu0 %v4411_v18  ;;  %3938 = vmatpush3.msra.mxu1 %v4453_v17 }
 0x839   :  { %3929 = vmatpush3.msra.mxu0 %v4687_v47  ;;  %3939 = vmatprep.subr.mxu1 %v4411_v18 }
 0x83a   :  { %3930 = vmatprep.subr.mxu0 %v4411_v18  ;;  %3940 = vmatpush3.msra.mxu1 %v4456_v19 }
 0x83b   :  { %3931 = vmatpush3.msra.mxu0 %v4694_v48  ;;  %3941 = vmatprep.subr.mxu1 %v4411_v18 }
 0x83c   :  { %3932 = vmatprep.subr.mxu0 %v4411_v18  ;;  %3942 = vmatpush3.msra.mxu1 %v4463_v20 }
 0x83d   :  { %3933 = vmatpush3.msra.mxu0 %v4700_v49  ;;  %3943 = vmatprep.subr.mxu1 %v4411_v18 }
 0x83e   :  { %3935 = vmatmul.mubr.msk.f32.vlgmr.msra.gmra.mxu0 %vm239_vm2, %v1118_v50  ;;  %3948 = vmatprep.subr.mxu0 %v4411_v18 }
 0x83f   :  { %3949 = vmatpush3.msra.mxu0 %v4483_v25  ;;  %3944 = vmatpush3.msra.mxu1 %v4469_v21 }
 0x840   :  { %3950 = vmatprep.subr.mxu0 %v4411_v18  ;;  %3945 = vmatprep.mubr.msk.f32.mxu1 %vm4412_vm1, %v4411_v18 }
 0x841   :  { %3951 = vmatpush3.msra.mxu0 %v4486_v27  ;;  %3956 = vmatprep.mubr.msk.f32.mxu0 %vm4412_vm1, %v4411_v18 }
 0x842   :  { %3952 = vmatprep.subr.mxu0 %v4411_v18  ;;  %3959 = vmatprep.subr.mxu1 %v4411_v18 }
 0x843   :  { %3953 = vmatpush3.msra.mxu0 %v4492_v28 }
 0x844   :  { %3954 = vmatprep.subr.mxu0 %v4411_v18 }
 0x845   :  { %3955 = vmatpush3.msra.mxu0 %v4496_v29 }
 0x846   :  { %3970 = vmatprep.subr.mxu0 %v4411_v18 }
 0x8ec   :  { %v853_v53 = vpop.f32.mrf.mxu0  ;;  %v945_v54 = vpop.f32.mrf.mxu1 }
 0x8ed   :  { %v857_v56 = vadd.f32 %v853_v53, %v182_v51  ;;  %v946_v60 = vadd.f32 %v4516_v35, %v945_v54 }
 0x8ee   :  { %v3892_v57 = vpop.f32.mrf.mxu0  ;;  %v3903_v58 = vpop.f32.mrf.mxu1 }
 0x8ef   :  { %v858_v59 = vmul.f32 %v4444_v5, %v857_v56 }
 0x8f1   :  { %4266 = vtanh.f32 %v858_v59 }
 0x8f5   :  { %v1020_v61 = vpop.f32.mrf.mxu0  ;;  %v1112_v62 = vpop.f32.mrf.mxu1 }
 0x8f6   :  { %v1024_v63 = vadd.f32 %v1020_v61, %v946_v60  ;;  %v1113_v16 = vadd.f32 %v4633_v39, %v1112_v62 }
 0x8f7   :  { %v3914_v0 = vpop.f32.mrf.mxu0  ;;  %v3925_v1 = vpop.f32.mrf.mxu1 }
 0x8f8   :  { %v1025_v2 = vmul.f32 %v4444_v5, %v1024_v63 }
 0x8fa   :  { %4268 = vtanh.f32 %v1025_v2 }
 0x8fe   :  { %v4267_v3 = vpop.eup %4266  ;;  %v1187_v15 = vpop.f32.mrf.mxu0 }
 0x8ff   :  { %v1191_v22 = vadd.f32 %v1187_v15, %v1113_v16  ;;  %864 = vrot.lane.b32.xlu0 %v4267_v3, %s4409_s1  ;;  %v860_v37 = vmul.f32 0.5, %v4267_v3 }
 0x900   :  { %v3936_v31 = vpop.f32.mrf.mxu0 }
 0x901   :  { %v1192_v33 = vmul.f32 %v4444_v5, %v1191_v22  ;;  %v861_v55 = vadd.f32 0.5, %v860_v37 }
 0x903   :  { %4270 = vtanh.f32 %v1192_v33  ;;  %v862_v54 = vmul.f32 %v861_v55, %v4646_v8 }
 0x907   :  { %v4269_v36 = vpop.eup %4268 }
 0x908   :  { %1031 = vrot.lane.b32.xlu1 %v4269_v36, %s4409_s1  ;;  %v1027_v41 = vmul.f32 0.5, %v4269_v36 }
 0x90a   :  { %v1028_v42 = vadd.f32 0.5, %v1027_v41 }
 0x90c   :  { %v1029_v58 = vmul.f32 %v1028_v42, %v4650_v32 }
 0x910   :  { %v4271_v52 = vpop.eup %4270 }
 0x911   :  { %1198 = vrot.lane.b32.xlu0 %v4271_v52, %s4409_s1  ;;  %v1194_v45 = vmul.f32 0.5, %v4271_v52 }
 0x913   :  { %v1195_v50 = vadd.f32 0.5, %v1194_v45 }
 0x915   :  { %v1196_v62 = vmul.f32 %v1195_v50, %v4652_v34 }
 0x971   :  { %v865_v38 = vpop.permute.xlu0 %864 }
 0x972   :  { %v867_v40 = vmul.f32 %v865_v38, %v861_v55 }
 0x974   :  { %869 = vrot.lane.b32.xlu1 %v867_v40, %s4410_s20 }
 0x97a   :  { %v1032_v43 = vpop.permute.xlu1 %1031 }
 0x97b   :  { %v1034_v44 = vmul.f32 %v1032_v43, %v1028_v42 }
 0x97d   :  { %1036 = vrot.lane.b32.xlu0 %v1034_v44, %s4410_s20 }
 0x983   :  { %v1199_v51 = vpop.permute.xlu0 %1198 }
 0x984   :  { %v1201_v53 = vmul.f32 %v1199_v51, %v1195_v50 }
 0x986   :  { %1203 = vrot.lane.b32.xlu1 %v1201_v53, %s4410_s20 }
 0x9e6   :  { %v870_v56 = vpop.permute.xlu1 %869 }
 0x9e7   :  { %v4739_v57 = vadd.f32 %v870_v56, %v862_v54 }
 0x9e9   :  { %4272 = vtanh.f32 %v4739_v57 }
 0x9ef   :  { %v1037_v59 = vpop.permute.xlu0 %1036 }
 0x9f0   :  { %v4743_v60 = vadd.f32 %v1037_v59, %v1029_v58 }
 0x9f2   :  { %4274 = vtanh.f32 %v4743_v60 }
 0x9f6   :  { %v4273_v61 = vpop.eup %4272 }
 0x9f7   :  { %875 = vrot.lane.b32.xlu0 %v4273_v61, %s4409_s1 }
 0x9f8   :  { %v1204_v63 = vpop.permute.xlu1 %1203 }
 0x9f9   :  { %v4748_v0 = vadd.f32 %v1204_v63, %v1196_v62 }
 0x9fb   :  { %4276 = vtanh.f32 %v4748_v0 }
 0x9ff   :  { %v4275_v8 = vpop.eup %4274 }
 0xa00   :  { %1042 = vrot.lane.b32.xlu1 %v4275_v8, %s4409_s1 }
 0xa08   :  { %v4277_v1 = vpop.eup %4276 }
 0xa09   :  { %1209 = vrot.lane.b32.xlu0 %v4277_v1, %s4409_s1 }
 0xa69   :  { %v876_v32 = vpop.permute.xlu0 %875 }
 0xa6a   :  { %v878_v2 = vmul.f32 %v876_v32, %v861_v55 }
 0xa6c   :  { %1215 = vrot.lane.b32.xlu1 %v878_v2, %s4410_s20 }
 0xa72   :  { %v1043_v16 = vpop.permute.xlu1 %1042 }
 0xa73   :  { %v1045_v3 = vmul.f32 %v1043_v16, %v1028_v42 }
 0xa75   :  { %1382 = vrot.lane.b32.xlu0 %v1045_v3, %s4410_s20 }
 0xa7b   :  { %v1210_v34 = vpop.permute.xlu0 %1209 }
 0xa7c   :  { %v1212_v15 = vmul.f32 %v1210_v34, %v1195_v50 }
 0xa7e   :  { %1549 = vrot.lane.b32.xlu1 %v1212_v15, %s4410_s20 }
 0xade   :  { %v1216_v22 = vpop.permute.xlu1 %1215 }
 0xadf   :  { %3946 = vmatmul.mubr.msk.f32.vlgmr.msra.gmra.mxu1 %vm239_vm2, %v1216_v22  ;;  %3957 = vmatmul.mubr.msk.f32.vlgmr.msra.gmra.mxu0 %vm239_vm2, %v1216_v22 }
 0xae0   :  { %3960 = vmatpush3.msra.mxu1 %v4561_v6  ;;  %3971 = vmatpush3.msra.mxu0 %v4563_v7 }
 0xae1   :  { %3961 = vmatprep.subr.mxu1 %v4411_v18  ;;  %3972 = vmatprep.subr.mxu0 %v4411_v18 }
 0xae2   :  { %3962 = vmatpush3.msra.mxu1 %v4567_v9  ;;  %3973 = vmatpush3.msra.mxu0 %v4569_v10 }
 0xae3   :  { %3963 = vmatprep.subr.mxu1 %v4411_v18  ;;  %3974 = vmatprep.subr.mxu0 %v4411_v18 }
 0xae4   :  { %3964 = vmatpush3.msra.mxu1 %v4575_v11  ;;  %3975 = vmatpush3.msra.mxu0 %v4577_v12 }
 0xae5   :  { %3965 = vmatprep.subr.mxu1 %v4411_v18  ;;  %3976 = vmatprep.subr.mxu0 %v4411_v18 }
 0xae6   :  { %3966 = vmatpush3.msra.mxu1 %v4583_v13  ;;  %3967 = vmatprep.mubr.msk.f32.mxu1 %vm4412_vm1, %v4411_v18 }
 0xae7   :  { %3977 = vmatpush3.msra.mxu0 %v4587_v14  ;;  %3978 = vmatprep.mubr.msk.f32.mxu0 %vm4412_vm1, %v4411_v18  ;;  %v1383_v31 = vpop.permute.xlu0 %1382 }
 0xae8   :  { %3968 = vmatmul.mubr.msk.f32.vlgmr.msra.gmra.mxu1 %vm239_vm2, %v1383_v31  ;;  %3979 = vmatmul.mubr.msk.f32.vlgmr.msra.gmra.mxu0 %vm239_vm2, %v1383_v31 }
 0xae9   :  { %3981 = vmatprep.subr.mxu1 %v4411_v18  ;;  %3989 = vmatprep.mubr.msk.f32.mxu1 %vm4412_vm1, %v4411_v18 }
 0xaea   :  { %3982 = vmatpush3.msra.mxu1 %v4682_v46  ;;  %3992 = vmatprep.subr.mxu0 %v4411_v18 }
 0xaeb   :  { %3983 = vmatprep.subr.mxu1 %v4411_v18  ;;  %3993 = vmatpush3.msra.mxu0 %v4453_v17  ;;  %v187_v17 = vadd.f32 %v4442_v4, %v4625_v24 }
 0xaec   :  { %3984 = vmatpush3.msra.mxu1 %v4687_v47  ;;  %3994 = vmatprep.subr.mxu0 %v4411_v18 }
 0xaed   :  { %3985 = vmatprep.subr.mxu1 %v4411_v18  ;;  %3995 = vmatpush3.msra.mxu0 %v4456_v19 }
 0xaee   :  { %3986 = vmatpush3.msra.mxu1 %v4694_v48  ;;  %3996 = vmatprep.subr.mxu0 %v4411_v18 }
 0xaef   :  { %3987 = vmatprep.subr.mxu1 %v4411_v18  ;;  %3997 = vmatpush3.msra.mxu0 %v4463_v20 }
 0xaf0   :  { %v1550_v33 = vpop.permute.xlu1 %1549  ;;  %3988 = vmatpush3.msra.mxu1 %v4700_v49  ;;  %3998 = vmatprep.subr.mxu0 %v4411_v18 }
 0xaf1   :  { %3990 = vmatmul.mubr.msk.f32.vlgmr.msra.gmra.mxu1 %vm239_vm2, %v1550_v33  ;;  %4003 = vmatprep.subr.mxu1 %v4411_v18 }
 0xaf2   :  { %4004 = vmatpush3.msra.mxu1 %v4483_v25  ;;  %3999 = vmatpush3.msra.mxu0 %v4469_v21 }
 0xaf3   :  { %4005 = vmatprep.subr.mxu1 %v4411_v18  ;;  %4000 = vmatprep.mubr.msk.f32.mxu0 %vm4412_vm1, %v4411_v18 }
 0xaf4   :  { %4006 = vmatpush3.msra.mxu1 %v4486_v27  ;;  %4011 = vmatprep.mubr.msk.f32.mxu1 %vm4412_vm1, %v4411_v18 }
 0xaf5   :  { %4007 = vmatprep.subr.mxu1 %v4411_v18  ;;  %4014 = vmatprep.subr.mxu0 %v4411_v18 }
 0xaf6   :  { %4008 = vmatpush3.msra.mxu1 %v4492_v28 }
 0xaf7   :  { %4009 = vmatprep.subr.mxu1 %v4411_v18 }
 0xaf8   :  { %4010 = vmatpush3.msra.mxu1 %v4496_v29 }
 0xaf9   :  { %4025 = vmatprep.subr.mxu1 %v4411_v18 }
 0xb9f   :  { %v1285_v19 = vpop.f32.mrf.mxu1  ;;  %v1377_v20 = vpop.f32.mrf.mxu0 }
 0xba0   :  { %v1289_v21 = vadd.f32 %v1285_v19, %v187_v17  ;;  %v1378_v55 = vadd.f32 %v4516_v35, %v1377_v20 }
 0xba1   :  { %v3947_v36 = vpop.f32.mrf.mxu1  ;;  %v3958_v52 = vpop.f32.mrf.mxu0 }
 0xba2   :  { %v1290_v37 = vmul.f32 %v4444_v5, %v1289_v21 }
 0xba4   :  { %4278 = vtanh.f32 %v1290_v37 }
 0xba8   :  { %v1452_v38 = vpop.f32.mrf.mxu1  ;;  %v1544_v40 = vpop.f32.mrf.mxu0 }
 0xba9   :  { %v1456_v41 = vadd.f32 %v1452_v38, %v1378_v55  ;;  %v1545_v4 = vadd.f32 %v4633_v39, %v1544_v40 }
 0xbaa   :  { %v3969_v42 = vpop.f32.mrf.mxu1  ;;  %v3980_v43 = vpop.f32.mrf.mxu0 }
 0xbab   :  { %v1457_v44 = vmul.f32 %v4444_v5, %v1456_v41  ;;  %v4870_v43 = vld [vmem:[#allocation3 + $0x20] sm:$0xff] }
 0xbad   :  { %4280 = vtanh.f32 %v1457_v44  ;;  %v4876_v44 = vld [vmem:[#allocation3 + $0x18] sm:$0xff] }
 0xbb1   :  { %v4279_v24 = vpop.eup %4278  ;;  %v1619_v45 = vpop.f32.mrf.mxu1 }
 0xbb2   :  { %v1623_v50 = vadd.f32 %v1619_v45, %v1545_v4  ;;  %1296 = vrot.lane.b32.xlu0 %v4279_v24, %s4409_s1  ;;  %v1292_v58 = vmul.f32 0.5, %v4279_v24  ;;  %v4882_v4 = vld [vmem:[#allocation3 + $0x10] sm:$0xff]  ;;  %v4890_v45 = vld [vmem:[#allocation3 + $0x8] sm:$0xff] }
 0xbb3   :  { %v3991_v51 = vpop.f32.mrf.mxu1 }
 0xbb4   :  { %v1624_v53 = vmul.f32 %v4444_v5, %v1623_v50  ;;  %v1293_v59 = vadd.f32 0.5, %v1292_v58  ;;  %v4909_v58 = vld [vmem:[#allocation3 + $0xe8] ss:$0 sm:$0xff] }
 0xbb6   :  { %4282 = vtanh.f32 %v1624_v53  ;;  %v1294_v34 = vmul.f32 %v1293_v59, %v4739_v57 }
 0xbba   :  { %v4281_v54 = vpop.eup %4280 }
 0xbbb   :  { %1463 = vrot.lane.b32.xlu1 %v4281_v54, %s4409_s1  ;;  %v1459_v63 = vmul.f32 0.5, %v4281_v54 }
 0xbbd   :  { %v1460_v8 = vadd.f32 0.5, %v1459_v63 }
 0xbbf   :  { %v1461_v31 = vmul.f32 %v1460_v8, %v4743_v60 }
 0xbc3   :  { %v4283_v56 = vpop.eup %4282 }
 0xbc4   :  { %1630 = vrot.lane.b32.xlu0 %v4283_v56, %s4409_s1  ;;  %v1626_v5 = vmul.f32 0.5, %v4283_v56 }
 0xbc6   :  { %v1627_v2 = vadd.f32 0.5, %v1626_v5 }
 0xbc8   :  { %v1628_v20 = vmul.f32 %v1627_v2, %v4748_v0 }
 0xc24   :  { %v1297_v61 = vpop.permute.xlu0 %1296 }
 0xc25   :  { %v1299_v62 = vmul.f32 %v1297_v61, %v1293_v59 }
 0xc27   :  { %1301 = vrot.lane.b32.xlu1 %v1299_v62, %s4410_s20 }
 0xc2d   :  { %v1464_v1 = vpop.permute.xlu1 %1463 }
 0xc2e   :  { %v1466_v32 = vmul.f32 %v1464_v1, %v1460_v8 }
 0xc30   :  { %1468 = vrot.lane.b32.xlu0 %v1466_v32, %s4410_s20 }
 0xc36   :  { %v1631_v16 = vpop.permute.xlu0 %1630 }
 0xc37   :  { %v1633_v3 = vmul.f32 %v1631_v16, %v1627_v2 }
 0xc39   :  { %1635 = vrot.lane.b32.xlu1 %v1633_v3, %s4410_s20 }
 0xc99   :  { %v1302_v15 = vpop.permute.xlu1 %1301 }
 0xc9a   :  { %v4825_v22 = vadd.f32 %v1302_v15, %v1294_v34 }
 0xc9c   :  { %4284 = vtanh.f32 %v4825_v22 }
 0xca2   :  { %v1469_v33 = vpop.permute.xlu0 %1468 }
 0xca3   :  { %v4829_v17 = vadd.f32 %v1469_v33, %v1461_v31 }
 0xca5   :  { %4286 = vtanh.f32 %v4829_v17 }
 0xca9   :  { %v4285_v19 = vpop.eup %4284 }
 0xcaa   :  { %1307 = vrot.lane.b32.xlu0 %v4285_v19, %s4409_s1 }
 0xcab   :  { %v1636_v21 = vpop.permute.xlu1 %1635 }
 0xcac   :  { %v4834_v36 = vadd.f32 %v1636_v21, %v1628_v20 }
 0xcae   :  { %4288 = vtanh.f32 %v4834_v36 }
 0xcb2   :  { %v4287_v57 = vpop.eup %4286 }
 0xcb3   :  { %1474 = vrot.lane.b32.xlu1 %v4287_v57, %s4409_s1 }
 0xcbb   :  { %v4289_v52 = vpop.eup %4288 }
 0xcbc   :  { %1641 = vrot.lane.b32.xlu0 %v4289_v52, %s4409_s1 }
 0xd1c   :  { %v1308_v60 = vpop.permute.xlu0 %1307 }
 0xd1d   :  { %v1310_v37 = vmul.f32 %v1308_v60, %v1293_v59 }
 0xd1f   :  { %1647 = vrot.lane.b32.xlu1 %v1310_v37, %s4410_s20 }
 0xd25   :  { %v1475_v55 = vpop.permute.xlu1 %1474 }
 0xd26   :  { %v1477_v38 = vmul.f32 %v1475_v55, %v1460_v8 }
 0xd28   :  { %1814 = vrot.lane.b32.xlu0 %v1477_v38, %s4410_s20 }
 0xd2e   :  { %v1642_v0 = vpop.permute.xlu0 %1641 }
 0xd2f   :  { %v1644_v40 = vmul.f32 %v1642_v0, %v1627_v2 }
 0xd31   :  { %1981 = vrot.lane.b32.xlu1 %v1644_v40, %s4410_s20 }
 0xd91   :  { %v1648_v41 = vpop.permute.xlu1 %1647 }
 0xd92   :  { %4001 = vmatmul.mubr.msk.f32.vlgmr.msra.gmra.mxu0 %vm239_vm2, %v1648_v41  ;;  %4012 = vmatmul.mubr.msk.f32.vlgmr.msra.gmra.mxu1 %vm239_vm2, %v1648_v41 }
 0xd93   :  { %4015 = vmatpush3.msra.mxu0 %v4561_v6  ;;  %4026 = vmatpush3.msra.mxu1 %v4563_v7 }
 0xd94   :  { %4016 = vmatprep.subr.mxu0 %v4411_v18  ;;  %4027 = vmatprep.subr.mxu1 %v4411_v18 }
 0xd95   :  { %4017 = vmatpush3.msra.mxu0 %v4567_v9  ;;  %4028 = vmatpush3.msra.mxu1 %v4569_v10 }
 0xd96   :  { %4018 = vmatprep.subr.mxu0 %v4411_v18  ;;  %4029 = vmatprep.subr.mxu1 %v4411_v18 }
 0xd97   :  { %4019 = vmatpush3.msra.mxu0 %v4575_v11  ;;  %4030 = vmatpush3.msra.mxu1 %v4577_v12 }
 0xd98   :  { %4020 = vmatprep.subr.mxu0 %v4411_v18  ;;  %4031 = vmatprep.subr.mxu1 %v4411_v18 }
 0xd99   :  { %4021 = vmatpush3.msra.mxu0 %v4583_v13  ;;  %4022 = vmatprep.mubr.msk.f32.mxu0 %vm4412_vm1, %v4411_v18 }
 0xd9a   :  { %4032 = vmatpush3.msra.mxu1 %v4587_v14  ;;  %4033 = vmatprep.mubr.msk.f32.mxu1 %vm4412_vm1, %v4411_v18  ;;  %v1815_v42 = vpop.permute.xlu0 %1814 }
 0xd9b   :  { %4023 = vmatmul.mubr.msk.f32.vlgmr.msra.gmra.mxu0 %vm239_vm2, %v1815_v42  ;;  %4034 = vmatmul.mubr.msk.f32.vlgmr.msra.gmra.mxu1 %vm239_vm2, %v1815_v42 }
 0xd9c   :  { %4036 = vmatprep.subr.mxu0 %v4411_v18  ;;  %4044 = vmatprep.mubr.msk.f32.mxu0 %vm4412_vm1, %v4411_v18 }
 0xd9d   :  { %4037 = vmatpush3.msra.mxu0 %v4682_v46  ;;  %4047 = vmatprep.subr.mxu1 %v4411_v18 }
 0xd9e   :  { %4038 = vmatprep.subr.mxu0 %v4411_v18  ;;  %4048 = vmatpush3.msra.mxu1 %v4870_v43 }
 0xd9f   :  { %4039 = vmatpush3.msra.mxu0 %v4687_v47  ;;  %4049 = vmatprep.subr.mxu1 %v4411_v18 }
 0xda0   :  { %4040 = vmatprep.subr.mxu0 %v4411_v18  ;;  %4050 = vmatpush3.msra.mxu1 %v4876_v44 }
 0xda1   :  { %4041 = vmatpush3.msra.mxu0 %v4694_v48  ;;  %4051 = vmatprep.subr.mxu1 %v4411_v18 }
 0xda2   :  { %4042 = vmatprep.subr.mxu0 %v4411_v18  ;;  %4052 = vmatpush3.msra.mxu1 %v4882_v4 }
 0xda3   :  { %v1982_v24 = vpop.permute.xlu1 %1981  ;;  %4043 = vmatpush3.msra.mxu0 %v4700_v49  ;;  %4053 = vmatprep.subr.mxu1 %v4411_v18 }
 0xda4   :  { %4045 = vmatmul.mubr.msk.f32.vlgmr.msra.gmra.mxu0 %vm239_vm2, %v1982_v24  ;;  %4058 = vmatprep.subr.mxu0 %v4411_v18 }
 0xda5   :  { %4059 = vmatpush3.msra.mxu0 %v4483_v25  ;;  %4054 = vmatpush3.msra.mxu1 %v4890_v45  ;;  %v4905_v25 = vld [vmem:[#allocation3 + $0x28] ss:$0 sm:$0xff] }
 0xda6   :  { %4060 = vmatprep.subr.mxu0 %v4411_v18  ;;  %4055 = vmatprep.mubr.msk.f32.mxu1 %vm4412_vm1, %v4411_v18 }
 0xda7   :  { %4061 = vmatpush3.msra.mxu0 %v4486_v27  ;;  %4066 = vmatprep.mubr.msk.f32.mxu0 %vm4412_vm1, %v4411_v18  ;;  %v192_v27 = vadd.f32 %v4905_v25, %v4623_v23 }
 0xda8   :  { %4062 = vmatprep.subr.mxu0 %v4411_v18  ;;  %4069 = vmatprep.subr.mxu1 %v4411_v18 }
 0xda9   :  { %4063 = vmatpush3.msra.mxu0 %v4492_v28 }
 0xdaa   :  { %4064 = vmatprep.subr.mxu0 %v4411_v18 }
 0xdab   :  { %4065 = vmatpush3.msra.mxu0 %v4496_v29 }
 0xdac   :  { %4080 = vmatprep.subr.mxu0 %v4411_v18 }
 0xe52   :  { %v1717_v50 = vpop.f32.mrf.mxu0  ;;  %v1809_v51 = vpop.f32.mrf.mxu1 }
 0xe53   :  { %v1721_v53 = vadd.f32 %v1717_v50, %v192_v27  ;;  %v1810_v59 = vadd.f32 %v4516_v35, %v1809_v51 }
 0xe54   :  { %v4002_v54 = vpop.f32.mrf.mxu0  ;;  %v4013_v56 = vpop.f32.mrf.mxu1 }
 0xe55   :  { %v1722_v28 = vmul.f32 %v4909_v58, %v1721_v53 }
 0xe57   :  { %4290 = vtanh.f32 %v1722_v28 }
 0xe5b   :  { %v1884_v29 = vpop.f32.mrf.mxu0  ;;  %v1976_v61 = vpop.f32.mrf.mxu1 }
 0xe5c   :  { %v1888_v62 = vadd.f32 %v1884_v29, %v1810_v59  ;;  %v1977_v23 = vadd.f32 %v4633_v39, %v1976_v61 }
 0xe5d   :  { %v4024_v63 = vpop.f32.mrf.mxu0  ;;  %v4035_v8 = vpop.f32.mrf.mxu1 }
 0xe5e   :  { %v1889_v1 = vmul.f32 %v4909_v58, %v1888_v62  ;;  %v5006_v8 = vld [vmem:[#allocation3 + $0x70] ss:$0 sm:$0xff] }
 0xe60   :  { %4292 = vtanh.f32 %v1889_v1 }
 0xe64   :  { %v4291_v32 = vpop.eup %4290  ;;  %v2051_v5 = vpop.f32.mrf.mxu0 }
 0xe65   :  { %v2055_v2 = vadd.f32 %v2051_v5, %v1977_v23  ;;  %1728 = vrot.lane.b32.xlu0 %v4291_v32, %s4409_s1  ;;  %v1724_v15 = vmul.f32 0.5, %v4291_v32 }
 0xe66   :  { %v4046_v16 = vpop.f32.mrf.mxu0 }
 0xe67   :  { %v2056_v3 = vmul.f32 %v4909_v58, %v2055_v2  ;;  %v1725_v31 = vadd.f32 0.5, %v1724_v15 }
 0xe69   :  { %4294 = vtanh.f32 %v2056_v3  ;;  %v1726_v0 = vmul.f32 %v1725_v31, %v4825_v22 }
 0xe6d   :  { %v4293_v35 = vpop.eup %4292 }
 0xe6e   :  { %1895 = vrot.lane.b32.xlu1 %v4293_v35, %s4409_s1  ;;  %v1891_v20 = vmul.f32 0.5, %v4293_v35 }
 0xe70   :  { %v1892_v21 = vadd.f32 0.5, %v1891_v20 }
 0xe72   :  { %v1893_v42 = vmul.f32 %v1892_v21, %v4829_v17 }
 0xe76   :  { %v4295_v34 = vpop.eup %4294 }
 0xe77   :  { %2062 = vrot.lane.b32.xlu0 %v4295_v34, %s4409_s1  ;;  %v2058_v60 = vmul.f32 0.5, %v4295_v34 }
 0xe79   :  { %v2059_v37 = vadd.f32 0.5, %v2058_v60 }
 0xe7b   :  { %v2060_v51 = vmul.f32 %v2059_v37, %v4834_v36 }
 0xed7   :  { %v1729_v33 = vpop.permute.xlu0 %1728 }
 0xed8   :  { %v1731_v19 = vmul.f32 %v1729_v33, %v1725_v31 }
 0xeda   :  { %1733 = vrot.lane.b32.xlu1 %v1731_v19, %s4410_s20 }
 0xee0   :  { %v1896_v57 = vpop.permute.xlu1 %1895 }
 0xee1   :  { %v1898_v52 = vmul.f32 %v1896_v57, %v1892_v21 }
 0xee3   :  { %1900 = vrot.lane.b32.xlu0 %v1898_v52, %s4410_s20 }
 0xee9   :  { %v2063_v55 = vpop.permute.xlu0 %2062 }
 0xeea   :  { %v2065_v38 = vmul.f32 %v2063_v55, %v2059_v37 }
 0xeec   :  { %2067 = vrot.lane.b32.xlu1 %v2065_v38, %s4410_s20 }
 0xf4c   :  { %v1734_v40 = vpop.permute.xlu1 %1733 }
 0xf4d   :  { %v4923_v41 = vadd.f32 %v1734_v40, %v1726_v0 }
 0xf4f   :  { %4296 = vtanh.f32 %v4923_v41 }
 0xf55   :  { %v1901_v24 = vpop.permute.xlu0 %1900 }
 0xf56   :  { %v4927_v27 = vadd.f32 %v1901_v24, %v1893_v42 }
 0xf58   :  { %4298 = vtanh.f32 %v4927_v27 }
 0xf5c   :  { %v4297_v50 = vpop.eup %4296 }
 0xf5d   :  { %1739 = vrot.lane.b32.xlu0 %v4297_v50, %s4409_s1 }
 0xf5e   :  { %v2068_v53 = vpop.permute.xlu1 %2067 }
 0xf5f   :  { %v4932_v54 = vadd.f32 %v2068_v53, %v2060_v51 }
 0xf61   :  { %4300 = vtanh.f32 %v4932_v54 }
 0xf65   :  { %v4299_v22 = vpop.eup %4298 }
 0xf66   :  { %1906 = vrot.lane.b32.xlu1 %v4299_v22, %s4409_s1 }
 0xf6e   :  { %v4301_v56 = vpop.eup %4300 }
 0xf6f   :  { %2073 = vrot.lane.b32.xlu0 %v4301_v56, %s4409_s1 }
 0xfcf   :  { %v1740_v17 = vpop.permute.xlu0 %1739 }
 0xfd0   :  { %v1742_v28 = vmul.f32 %v1740_v17, %v1725_v31 }
 0xfd2   :  { %2079 = vrot.lane.b32.xlu1 %v1742_v28, %s4410_s20 }
 0xfd8   :  { %v1907_v59 = vpop.permute.xlu1 %1906 }
 0xfd9   :  { %v1909_v29 = vmul.f32 %v1907_v59, %v1892_v21 }
 0xfdb   :  { %2246 = vrot.lane.b32.xlu0 %v1909_v29, %s4410_s20 }
 0xfe1   :  { %v2074_v36 = vpop.permute.xlu0 %2073 }
 0xfe2   :  { %v2076_v61 = vmul.f32 %v2074_v36, %v2059_v37 }
 0xfe4   :  { %2413 = vrot.lane.b32.xlu1 %v2076_v61, %s4410_s20 }
0x1044   :  { %v2080_v62 = vpop.permute.xlu1 %2079 }
0x1045   :  { %4056 = vmatmul.mubr.msk.f32.vlgmr.msra.gmra.mxu1 %vm239_vm2, %v2080_v62  ;;  %4067 = vmatmul.mubr.msk.f32.vlgmr.msra.gmra.mxu0 %vm239_vm2, %v2080_v62 }
0x1046   :  { %4070 = vmatpush3.msra.mxu1 %v4561_v6  ;;  %4081 = vmatpush3.msra.mxu0 %v4563_v7 }
0x1047   :  { %4071 = vmatprep.subr.mxu1 %v4411_v18  ;;  %4082 = vmatprep.subr.mxu0 %v4411_v18 }
0x1048   :  { %4072 = vmatpush3.msra.mxu1 %v4567_v9  ;;  %4083 = vmatpush3.msra.mxu0 %v4569_v10  ;;  %v4981_v9 = vld [vmem:[#allocation3 + $0x48] sm:$0xff]  ;;  %v4988_v10 = vld [vmem:[#allocation3 + $0x40] sm:$0xff] }
0x1049   :  { %4073 = vmatprep.subr.mxu1 %v4411_v18  ;;  %4084 = vmatprep.subr.mxu0 %v4411_v18 }
0x104a   :  { %4074 = vmatpush3.msra.mxu1 %v4575_v11  ;;  %4085 = vmatpush3.msra.mxu0 %v4577_v12  ;;  %v4995_v11 = vld [vmem:[#allocation3 + $0x38] sm:$0xff]  ;;  %v4999_v12 = vld [vmem:[#allocation3 + $0x30] sm:$0xff] }
0x104b   :  { %4075 = vmatprep.subr.mxu1 %v4411_v18  ;;  %4086 = vmatprep.subr.mxu0 %v4411_v18 }
0x104c   :  { %4076 = vmatpush3.msra.mxu1 %v4583_v13  ;;  %4077 = vmatprep.mubr.msk.f32.mxu1 %vm4412_vm1, %v4411_v18  ;;  %v197_v13 = vadd.f32 %v4905_v25, %v4629_v30 }
0x104d   :  { %4087 = vmatpush3.msra.mxu0 %v4587_v14  ;;  %4088 = vmatprep.mubr.msk.f32.mxu0 %vm4412_vm1, %v4411_v18  ;;  %v2247_v6 = vpop.permute.xlu0 %2246 }
0x104e   :  { %4078 = vmatmul.mubr.msk.f32.vlgmr.msra.gmra.mxu1 %vm239_vm2, %v2247_v6  ;;  %4089 = vmatmul.mubr.msk.f32.vlgmr.msra.gmra.mxu0 %vm239_vm2, %v2247_v6 }
0x104f   :  { %4091 = vmatprep.subr.mxu1 %v4411_v18  ;;  %4099 = vmatprep.mubr.msk.f32.mxu1 %vm4412_vm1, %v4411_v18 }
0x1050   :  { %4092 = vmatpush3.msra.mxu1 %v4682_v46  ;;  %4102 = vmatprep.subr.mxu0 %v4411_v18 }
0x1051   :  { %4093 = vmatprep.subr.mxu1 %v4411_v18  ;;  %4103 = vmatpush3.msra.mxu0 %v4870_v43 }
0x1052   :  { %4094 = vmatpush3.msra.mxu1 %v4687_v47  ;;  %4104 = vmatprep.subr.mxu0 %v4411_v18 }
0x1053   :  { %4095 = vmatprep.subr.mxu1 %v4411_v18  ;;  %4105 = vmatpush3.msra.mxu0 %v4876_v44 }
0x1054   :  { %4096 = vmatpush3.msra.mxu1 %v4694_v48  ;;  %4106 = vmatprep.subr.mxu0 %v4411_v18 }
0x1055   :  { %4097 = vmatprep.subr.mxu1 %v4411_v18  ;;  %4107 = vmatpush3.msra.mxu0 %v4882_v4 }
0x1056   :  { %v2414_v7 = vpop.permute.xlu1 %2413  ;;  %4098 = vmatpush3.msra.mxu1 %v4700_v49  ;;  %4108 = vmatprep.subr.mxu0 %v4411_v18 }
0x1057   :  { %4100 = vmatmul.mubr.msk.f32.vlgmr.msra.gmra.mxu1 %vm239_vm2, %v2414_v7  ;;  %4113 = vmatprep.subr.mxu1 %v4411_v18 }
0x1058   :  { %4114 = vmatpush3.msra.mxu1 %v4981_v9  ;;  %4109 = vmatpush3.msra.mxu0 %v4890_v45 }
0x1059   :  { %4115 = vmatprep.subr.mxu1 %v4411_v18  ;;  %4110 = vmatprep.mubr.msk.f32.mxu0 %vm4412_vm1, %v4411_v18 }
0x105a   :  { %4116 = vmatpush3.msra.mxu1 %v4988_v10  ;;  %4121 = vmatprep.mubr.msk.f32.mxu1 %vm4412_vm1, %v4411_v18 }
0x105b   :  { %4117 = vmatprep.subr.mxu1 %v4411_v18  ;;  %4124 = vmatprep.subr.mxu0 %v4411_v18 }
0x105c   :  { %4118 = vmatpush3.msra.mxu1 %v4995_v11 }
0x105d   :  { %4119 = vmatprep.subr.mxu1 %v4411_v18 }
0x105e   :  { %4120 = vmatpush3.msra.mxu1 %v4999_v12 }
0x105f   :  { %4135 = vmatprep.subr.mxu1 %v4411_v18 }
0x1105   :  { %v2149_v14 = vpop.f32.mrf.mxu1  ;;  %v2241_v43 = vpop.f32.mrf.mxu0 }
0x1106   :  { %v2153_v44 = vadd.f32 %v2149_v14, %v197_v13  ;;  %v2242_v1 = vadd.f32 %v5006_v8, %v2241_v43  ;;  %v4349_v43 = vld [vmem:[#allocation3 + $0x68] sm:$0xff] }
0x1107   :  { %v4057_v4 = vpop.f32.mrf.mxu1  ;;  %v4068_v45 = vpop.f32.mrf.mxu0 }
0x1108   :  { %v2154_v63 = vmul.f32 %v4909_v58, %v2153_v44  ;;  %v5038_v44 = vld [vmem:[#allocation3 + $0x90] sm:$0xff]  ;;  %v4351_v4 = vld [vmem:[#allocation3 + $0x60] sm:$0xff]  ;;  %v5043_v45 = vld [vmem:[#allocation3 + $0x88] sm:$0xff] }
0x110a   :  { %4302 = vtanh.f32 %v2154_v63  ;;  %v4353_v63 = vld [vmem:[#allocation3 + $0x58] sm:$0xff] }
0x110e   :  { %v2316_v23 = vpop.f32.mrf.mxu1  ;;  %v2408_v32 = vpop.f32.mrf.mxu0 }
0x110f   :  { %v2320_v5 = vadd.f32 %v2316_v23, %v2242_v1  ;;  %v2409_v30 = vadd.f32 %v4633_v39, %v2408_v32  ;;  %v5048_v1 = vld [vmem:[#allocation3 + $0x80] sm:$0xff]  ;;  %v4355_v23 = vld [vmem:[#allocation3 + $0x50] sm:$0xff]  ;;  %v5055_v32 = vld [vmem:[#allocation3 + $0x78] sm:$0xff] }
0x1110   :  { %v4079_v2 = vpop.f32.mrf.mxu1  ;;  %v4090_v16 = vpop.f32.mrf.mxu0 }
0x1111   :  { %v2321_v3 = vmul.f32 %v4909_v58, %v2320_v5 }
0x1113   :  { %4304 = vtanh.f32 %v2321_v3 }
0x1117   :  { %v4303_v35 = vpop.eup %4302  ;;  %v2483_v34 = vpop.f32.mrf.mxu1 }
0x1118   :  { %v2487_v15 = vadd.f32 %v2483_v34, %v2409_v30  ;;  %2160 = vrot.lane.b32.xlu0 %v4303_v35, %s4409_s1  ;;  %v2156_v21 = vmul.f32 0.5, %v4303_v35 }
0x1119   :  { %v4101_v31 = vpop.f32.mrf.mxu1 }
0x111a   :  { %v2488_v33 = vmul.f32 %v4909_v58, %v2487_v15  ;;  %v2157_v57 = vadd.f32 0.5, %v2156_v21  ;;  %v5096_v31 = vld [vmem:[#allocation3 + $0xb8] ss:$0 sm:$0xff] }
0x111c   :  { %4306 = vtanh.f32 %v2488_v33  ;;  %v2158_v50 = vmul.f32 %v2157_v57, %v4923_v41 }
0x1120   :  { %v4305_v19 = vpop.eup %4304 }
0x1121   :  { %2327 = vrot.lane.b32.xlu1 %v4305_v19, %s4409_s1  ;;  %v2323_v39 = vmul.f32 0.5, %v4305_v19 }
0x1123   :  { %v2324_v37 = vadd.f32 0.5, %v2323_v39 }
0x1125   :  { %v2325_v22 = vmul.f32 %v2324_v37, %v4927_v27 }
0x1129   :  { %v4307_v20 = vpop.eup %4306 }
0x112a   :  { %2494 = vrot.lane.b32.xlu0 %v4307_v20, %s4409_s1  ;;  %v2490_v0 = vmul.f32 0.5, %v4307_v20 }
0x112c   :  { %v2491_v40 = vadd.f32 0.5, %v2490_v0 }
0x112e   :  { %v2492_v59 = vmul.f32 %v2491_v40, %v4932_v54 }
0x118a   :  { %v2161_v52 = vpop.permute.xlu0 %2160 }
0x118b   :  { %v2163_v60 = vmul.f32 %v2161_v52, %v2157_v57 }
0x118d   :  { %2165 = vrot.lane.b32.xlu1 %v2163_v60, %s4410_s20 }
0x1193   :  { %v2328_v55 = vpop.permute.xlu1 %2327 }
0x1194   :  { %v2330_v38 = vmul.f32 %v2328_v55, %v2324_v37 }
0x1196   :  { %2332 = vrot.lane.b32.xlu0 %v2330_v38, %s4410_s20 }
0x119c   :  { %v2495_v42 = vpop.permute.xlu0 %2494 }
0x119d   :  { %v2497_v24 = vmul.f32 %v2495_v42, %v2491_v40 }
0x119f   :  { %2499 = vrot.lane.b32.xlu1 %v2497_v24, %s4410_s20 }
0x11ff   :  { %v2166_v51 = vpop.permute.xlu1 %2165 }
0x1200   :  { %v5019_v53 = vadd.f32 %v2166_v51, %v2158_v50 }
0x1202   :  { %4308 = vtanh.f32 %v5019_v53 }
0x1208   :  { %v2333_v56 = vpop.permute.xlu0 %2332 }
0x1209   :  { %v5023_v17 = vadd.f32 %v2333_v56, %v2325_v22 }
0x120b   :  { %4310 = vtanh.f32 %v5023_v17 }
0x120f   :  { %v4309_v28 = vpop.eup %4308 }
0x1210   :  { %2171 = vrot.lane.b32.xlu0 %v4309_v28, %s4409_s1 }
0x1211   :  { %v2500_v29 = vpop.permute.xlu1 %2499 }
0x1212   :  { %v5028_v36 = vadd.f32 %v2500_v29, %v2492_v59 }
0x1214   :  { %4312 = vtanh.f32 %v5028_v36 }
0x1218   :  { %v4311_v41 = vpop.eup %4310 }
0x1219   :  { %2338 = vrot.lane.b32.xlu1 %v4311_v41, %s4409_s1 }
0x1221   :  { %v4313_v61 = vpop.eup %4312 }
0x1222   :  { %2505 = vrot.lane.b32.xlu0 %v4313_v61, %s4409_s1 }
0x1282   :  { %v2172_v27 = vpop.permute.xlu0 %2171 }
0x1283   :  { %v2174_v62 = vmul.f32 %v2172_v27, %v2157_v57 }
0x1285   :  { %2511 = vrot.lane.b32.xlu1 %v2174_v62, %s4410_s20 }
0x128b   :  { %v2339_v6 = vpop.permute.xlu1 %2338 }
0x128c   :  { %v2341_v7 = vmul.f32 %v2339_v6, %v2324_v37 }
0x128e   :  { %2678 = vrot.lane.b32.xlu0 %v2341_v7, %s4410_s20 }
0x1294   :  { %v2506_v54 = vpop.permute.xlu0 %2505 }
0x1295   :  { %v2508_v13 = vmul.f32 %v2506_v54, %v2491_v40 }
0x1297   :  { %2845 = vrot.lane.b32.xlu1 %v2508_v13, %s4410_s20 }
0x12f7   :  { %v2512_v14 = vpop.permute.xlu1 %2511 }
0x12f8   :  { %4111 = vmatmul.mubr.msk.f32.vlgmr.msra.gmra.mxu0 %vm239_vm2, %v2512_v14  ;;  %4122 = vmatmul.mubr.msk.f32.vlgmr.msra.gmra.mxu1 %vm239_vm2, %v2512_v14 }
0x12f9   :  { %4125 = vmatpush3.msra.mxu0 %v4349_v43  ;;  %4136 = vmatpush3.msra.mxu1 %v5038_v44 }
0x12fa   :  { %4126 = vmatprep.subr.mxu0 %v4411_v18  ;;  %4137 = vmatprep.subr.mxu1 %v4411_v18 }
0x12fb   :  { %4127 = vmatpush3.msra.mxu0 %v4351_v4  ;;  %4138 = vmatpush3.msra.mxu1 %v5043_v45 }
0x12fc   :  { %4128 = vmatprep.subr.mxu0 %v4411_v18  ;;  %4139 = vmatprep.subr.mxu1 %v4411_v18 }
0x12fd   :  { %4129 = vmatpush3.msra.mxu0 %v4353_v63  ;;  %4140 = vmatpush3.msra.mxu1 %v5048_v1 }
0x12fe   :  { %4130 = vmatprep.subr.mxu0 %v4411_v18  ;;  %4141 = vmatprep.subr.mxu1 %v4411_v18 }
0x12ff   :  { %4131 = vmatpush3.msra.mxu0 %v4355_v23  ;;  %4132 = vmatprep.mubr.msk.f32.mxu0 %vm4412_vm1, %v4411_v18 }
0x1300   :  { %4142 = vmatpush3.msra.mxu1 %v5055_v32  ;;  %4143 = vmatprep.mubr.msk.f32.mxu1 %vm4412_vm1, %v4411_v18  ;;  %v2679_v5 = vpop.permute.xlu0 %2678 }
0x1301   :  { %4133 = vmatmul.mubr.msk.f32.vlgmr.msra.gmra.mxu0 %vm239_vm2, %v2679_v5  ;;  %4144 = vmatmul.mubr.msk.f32.vlgmr.msra.gmra.mxu1 %vm239_vm2, %v2679_v5  ;;  %v4358_v5 = vld [vmem:[#allocation3 + $0xb0] sm:$0xff] }
0x1302   :  { %4146 = vmatprep.subr.mxu0 %v4411_v18  ;;  %4154 = vmatprep.mubr.msk.f32.mxu0 %vm4412_vm1, %v4411_v18 }
0x1303   :  { %4147 = vmatpush3.msra.mxu0 %v4682_v46  ;;  %4157 = vmatprep.subr.mxu1 %v4411_v18 }
0x1304   :  { %4148 = vmatprep.subr.mxu0 %v4411_v18  ;;  %4158 = vmatpush3.msra.mxu1 %v4981_v9 }
0x1305   :  { %4149 = vmatpush3.msra.mxu0 %v4687_v47  ;;  %4159 = vmatprep.subr.mxu1 %v4411_v18  ;;  %v202_v47 = vadd.f32 %v4905_v25, %v4627_v26 }
0x1306   :  { %4150 = vmatprep.subr.mxu0 %v4411_v18  ;;  %4160 = vmatpush3.msra.mxu1 %v4988_v10 }
0x1307   :  { %4151 = vmatpush3.msra.mxu0 %v4694_v48  ;;  %4161 = vmatprep.subr.mxu1 %v4411_v18 }
0x1308   :  { %4152 = vmatprep.subr.mxu0 %v4411_v18  ;;  %4162 = vmatpush3.msra.mxu1 %v4995_v11 }
0x1309   :  { %v2846_v46 = vpop.permute.xlu1 %2845  ;;  %4153 = vmatpush3.msra.mxu0 %v4700_v49  ;;  %4163 = vmatprep.subr.mxu1 %v4411_v18 }
0x130a   :  { %4155 = vmatmul.mubr.msk.f32.vlgmr.msra.gmra.mxu0 %vm239_vm2, %v2846_v46  ;;  %4164 = vmatpush3.msra.mxu1 %v4999_v12  ;;  %v4359_v46 = vld [vmem:[#allocation3 + $0xa8] sm:$0xff] }
0x130b   :  { %4165 = vmatprep.mubr.msk.f32.mxu1 %vm4412_vm1, %v4411_v18  ;;  %4168 = vmatprep.subr.mxu0 %v4411_v18 }
0x130c   :  { %4179 = vmatprep.subr.mxu1 %v4411_v18  ;;  %4169 = vmatpush3.msra.mxu0 %v4349_v43 }
0x130d   :  { %4170 = vmatprep.subr.mxu0 %v4411_v18  ;;  %4176 = vmatprep.mubr.msk.f32.mxu0 %vm4412_vm1, %v4411_v18 }
0x130e   :  { %4171 = vmatpush3.msra.mxu0 %v4351_v4 }
0x130f   :  { %4172 = vmatprep.subr.mxu0 %v4411_v18 }
0x1310   :  { %4173 = vmatpush3.msra.mxu0 %v4353_v63 }
0x1311   :  { %4174 = vmatprep.subr.mxu0 %v4411_v18 }
0x1312   :  { %4175 = vmatpush3.msra.mxu0 %v4355_v23 }
0x1313   :  { %4190 = vmatprep.subr.mxu0 %v4411_v18 }
0x13b8   :  { %v2581_v48 = vpop.f32.mrf.mxu0  ;;  %v2673_v49 = vpop.f32.mrf.mxu1 }
0x13b9   :  { %v2585_v9 = vadd.f32 %v2581_v48, %v202_v47  ;;  %v2674_v2 = vadd.f32 %v5006_v8, %v2673_v49  ;;  %v4360_v47 = vld [vmem:[#allocation3 + $0xa0] sm:$0xff]  ;;  %v4361_v48 = vld [vmem:[#allocation3 + $0x98] sm:$0xff] }
0x13ba   :  { %v4112_v10 = vpop.f32.mrf.mxu0  ;;  %v4123_v11 = vpop.f32.mrf.mxu1 }
0x13bb   :  { %v2586_v12 = vmul.f32 %v4909_v58, %v2585_v9 }
0x13bd   :  { %4314 = vtanh.f32 %v2586_v12 }
0x13c1   :  { %v2748_v16 = vpop.f32.mrf.mxu0  ;;  %v2840_v3 = vpop.f32.mrf.mxu1 }
0x13c2   :  { %v2752_v30 = vadd.f32 %v2748_v16, %v2674_v2  ;;  %v2841_v26 = vadd.f32 %v5096_v31, %v2840_v3 }
0x13c3   :  { %v4134_v35 = vpop.f32.mrf.mxu0  ;;  %v4145_v34 = vpop.f32.mrf.mxu1 }
0x13c4   :  { %v2753_v15 = vmul.f32 %v4909_v58, %v2752_v30 }
0x13c6   :  { %4316 = vtanh.f32 %v2753_v15 }
0x13ca   :  { %v4315_v25 = vpop.eup %4314  ;;  %v2915_v33 = vpop.f32.mrf.mxu0 }
0x13cb   :  { %v2919_v19 = vadd.f32 %v2915_v33, %v2841_v26  ;;  %2592 = vrot.lane.b32.xlu0 %v4315_v25, %s4409_s1  ;;  %v2588_v60 = vmul.f32 0.5, %v4315_v25 }
0x13cc   :  { %v4156_v20 = vpop.f32.mrf.mxu0 }
0x13cd   :  { %v2920_v21 = vmul.f32 %v4909_v58, %v2919_v19  ;;  %v2589_v39 = vadd.f32 0.5, %v2588_v60 }
0x13cf   :  { %4318 = vtanh.f32 %v2920_v21  ;;  %v2590_v56 = vmul.f32 %v2589_v39, %v5019_v53 }
0x13d3   :  { %v4317_v57 = vpop.eup %4316 }
0x13d4   :  { %2759 = vrot.lane.b32.xlu1 %v4317_v57, %s4409_s1  ;;  %v2755_v38 = vmul.f32 0.5, %v4317_v57 }
0x13d6   :  { %v2756_v0 = vadd.f32 0.5, %v2755_v38 }
0x13d8   :  { %v2757_v29 = vmul.f32 %v2756_v0, %v5023_v17 }
0x13dc   :  { %v4319_v52 = vpop.eup %4318 }
0x13dd   :  { %2926 = vrot.lane.b32.xlu0 %v4319_v52, %s4409_s1  ;;  %v2922_v24 = vmul.f32 0.5, %v4319_v52 }
0x13df   :  { %v2923_v50 = vadd.f32 0.5, %v2922_v24 }
0x13e1   :  { %v2924_v62 = vmul.f32 %v2923_v50, %v5028_v36 }
0x143d   :  { %v2593_v37 = vpop.permute.xlu0 %2592 }
0x143e   :  { %v2595_v55 = vmul.f32 %v2593_v37, %v2589_v39 }
0x1440   :  { %2597 = vrot.lane.b32.xlu1 %v2595_v55, %s4410_s20 }
0x1446   :  { %v2760_v40 = vpop.permute.xlu1 %2759 }
0x1447   :  { %v2762_v42 = vmul.f32 %v2760_v40, %v2756_v0 }
0x1449   :  { %2764 = vrot.lane.b32.xlu0 %v2762_v42, %s4410_s20 }
0x144f   :  { %v2927_v51 = vpop.permute.xlu0 %2926 }
0x1450   :  { %v2929_v22 = vmul.f32 %v2927_v51, %v2923_v50 }
0x1452   :  { %2931 = vrot.lane.b32.xlu1 %v2929_v22, %s4410_s20 }
0x14b2   :  { %v2598_v28 = vpop.permute.xlu1 %2597 }
0x14b3   :  { %v2600_v59 = vadd.f32 %v2598_v28, %v2590_v56 }
0x14b5   :  { %4320 = vtanh.f32 %v2600_v59 }
0x14bb   :  { %v2765_v41 = vpop.permute.xlu0 %2764 }
0x14bc   :  { %v5108_v61 = vadd.f32 %v2765_v41, %v2757_v29 }
0x14be   :  { %4322 = vtanh.f32 %v5108_v61 }
0x14c2   :  { %v4321_v27 = vpop.eup %4320 }
0x14c3   :  { %2603 = vrot.lane.b32.xlu0 %v4321_v27, %s4409_s1 }
0x14c4   :  { %v2932_v6 = vpop.permute.xlu1 %2931 }
0x14c5   :  { %v5113_v7 = vadd.f32 %v2932_v6, %v2924_v62 }
0x14c7   :  { %4324 = vtanh.f32 %v5113_v7 }
0x14cb   :  { %v4323_v53 = vpop.eup %4322 }
0x14cc   :  { %2770 = vrot.lane.b32.xlu1 %v4323_v53, %s4409_s1 }
0x14d4   :  { %v4325_v54 = vpop.eup %4324 }
0x14d5   :  { %2937 = vrot.lane.b32.xlu0 %v4325_v54, %s4409_s1 }
0x1535   :  { %v2604_v17 = vpop.permute.xlu0 %2603 }
0x1536   :  { %v2606_v13 = vmul.f32 %v2604_v17, %v2589_v39 }
0x1538   :  { %2942 = vrot.lane.b32.xlu1 %v2606_v13, %s4410_s20 }
0x153e   :  { %v2771_v14 = vpop.permute.xlu1 %2770 }
0x153f   :  { %v2773_v43 = vmul.f32 %v2771_v14, %v2756_v0 }
0x1541   :  { %3017 = vrot.lane.b32.xlu0 %v2773_v43, %s4410_s20 }
0x1547   :  { %v2938_v36 = vpop.permute.xlu0 %2937 }
0x1548   :  { %v2940_v4 = vmul.f32 %v2938_v36, %v2923_v50 }
0x154a   :  { %3184 = vrot.lane.b32.xlu1 %v2940_v4, %s4410_s20  ;;  %v3454_v4 = vld [vmem:[#allocation3 + $0xd0] sm:$0xff] }
0x15aa   :  { %v2943_v63 = vpop.permute.xlu1 %2942 }
0x15ab   :  { %4166 = vmatmul.mubr.msk.f32.vlgmr.msra.gmra.mxu1 %vm239_vm2, %v2943_v63  ;;  %v3452_v63 = vld [vmem:[#allocation3 + $0xc0] sm:$0xff] }
0x15ac   :  { %4180 = vmatpush3.msra.mxu1 %v5038_v44  ;;  %4187 = vmatprep.mubr.msk.f32.mxu1 %vm4412_vm1, %v4411_v18 }
0x15ad   :  { %4181 = vmatprep.subr.mxu1 %v4411_v18 }
0x15ae   :  { %4182 = vmatpush3.msra.mxu1 %v5043_v45 }
0x15af   :  { %4183 = vmatprep.subr.mxu1 %v4411_v18 }
0x15b0   :  { %4184 = vmatpush3.msra.mxu1 %v5048_v1 }
0x15b1   :  { %4185 = vmatprep.subr.mxu1 %v4411_v18 }
0x15b2   :  { %4186 = vmatpush3.msra.mxu1 %v5055_v32 }
0x15b3   :  { %v3018_v23 = vpop.permute.xlu0 %3017  ;;  %4201 = vmatprep.subr.mxu1 %v4411_v18 }
0x15b4   :  { %4177 = vmatmul.mubr.msk.f32.vlgmr.msra.gmra.mxu0 %vm239_vm2, %v3018_v23  ;;  %4188 = vmatmul.mubr.msk.f32.vlgmr.msra.gmra.mxu1 %vm239_vm2, %v3018_v23 }
0x15b5   :  { %4191 = vmatpush3.msra.mxu0 %v4358_v5  ;;  %4198 = vmatprep.mubr.msk.f32.mxu0 %vm4412_vm1, %v4411_v18 }
0x15b6   :  { %4192 = vmatprep.subr.mxu0 %v4411_v18  ;;  %4202 = vmatpush3.msra.mxu1 %v5038_v44 }
0x15b7   :  { %4193 = vmatpush3.msra.mxu0 %v4359_v46  ;;  %4203 = vmatprep.subr.mxu1 %v4411_v18 }
0x15b8   :  { %4194 = vmatprep.subr.mxu0 %v4411_v18  ;;  %4204 = vmatpush3.msra.mxu1 %v5043_v45 }
0x15b9   :  { %4195 = vmatpush3.msra.mxu0 %v4360_v47  ;;  %4205 = vmatprep.subr.mxu1 %v4411_v18 }
0x15ba   :  { %4196 = vmatprep.subr.mxu0 %v4411_v18  ;;  %4206 = vmatpush3.msra.mxu1 %v5048_v1 }
0x15bb   :  { %4197 = vmatpush3.msra.mxu0 %v4361_v48  ;;  %4207 = vmatprep.subr.mxu1 %v4411_v18 }
0x15bc   :  { %v3185_v44 = vpop.permute.xlu1 %3184  ;;  %4208 = vmatpush3.msra.mxu1 %v5055_v32  ;;  %4209 = vmatprep.mubr.msk.f32.mxu1 %vm4412_vm1, %v4411_v18 }
0x15bd   :  { %4199 = vmatmul.mubr.msk.f32.vlgmr.msra.gmra.mxu0 %vm239_vm2, %v3185_v44  ;;  %4212 = vmatprep.subr.mxu0 %v4411_v18 }
0x15be   :  { %4213 = vmatpush3.msra.mxu0 %v4358_v5  ;;  %4220 = vmatprep.mubr.msk.f32.mxu0 %vm4412_vm1, %v4411_v18 }
0x15bf   :  { %4214 = vmatprep.subr.mxu0 %v4411_v18  ;;  %4223 = vmatprep.subr.mxu1 %v4411_v18 }
0x15c0   :  { %4215 = vmatpush3.msra.mxu0 %v4359_v46 }
0x15c1   :  { %4216 = vmatprep.subr.mxu0 %v4411_v18 }
0x15c2   :  { %4217 = vmatpush3.msra.mxu0 %v4360_v47 }
0x15c3   :  { %4218 = vmatprep.subr.mxu0 %v4411_v18 }
0x15c4   :  { %4219 = vmatpush3.msra.mxu0 %v4361_v48  ;;  %v3601_v48 = vld [vmem:[#allocation3 + $0xe0] ss:$0 sm:$0xff] }
0x166b   :  { %v3012_v45 = vpop.f32.mrf.mxu1 }
0x166c   :  { %v3013_v32 = vadd.f32 %v5006_v8, %v3012_v45 }
0x166d   :  { %v4167_v1 = vpop.f32.mrf.mxu1 }
0x1674   :  { %v3087_v49 = vpop.f32.mrf.mxu0  ;;  %v3179_v9 = vpop.f32.mrf.mxu1 }
0x1675   :  { %v3091_v10 = vadd.f32 %v3087_v49, %v3013_v32  ;;  %v3180_v16 = vadd.f32 %v5096_v31, %v3179_v9 }
0x1676   :  { %v4178_v11 = vpop.f32.mrf.mxu0  ;;  %v4189_v12 = vpop.f32.mrf.mxu1 }
0x1677   :  { %v3092_v2 = vmul.f32 %v4909_v58, %v3091_v10 }
0x1679   :  { %4326 = vtanh.f32 %v3092_v2 }
0x167d   :  { %v3254_v3 = vpop.f32.mrf.mxu0 }
0x167e   :  { %v3258_v30 = vadd.f32 %v3254_v3, %v3180_v16 }
0x167f   :  { %v4200_v35 = vpop.f32.mrf.mxu0 }
0x1680   :  { %v3259_v34 = vmul.f32 %v4909_v58, %v3258_v30 }
0x1682   :  { %4328 = vtanh.f32 %v3259_v34 }
0x1686   :  { %v4327_v15 = vpop.eup %4326 }
0x1687   :  { %3098 = vrot.lane.b32.xlu0 %v4327_v15, %s4409_s1  ;;  %v3094_v26 = vmul.f32 0.5, %v4327_v15 }
0x1689   :  { %v3095_v25 = vadd.f32 0.5, %v3094_v26 }
0x168b   :  { %v3096_v60 = vmul.f32 %v3095_v25, %v5108_v61 }
0x168f   :  { %v4329_v8 = vpop.eup %4328 }
0x1690   :  { %3265 = vrot.lane.b32.xlu1 %v4329_v8, %s4409_s1  ;;  %v3261_v20 = vmul.f32 0.5, %v4329_v8 }
0x1692   :  { %v3262_v21 = vadd.f32 0.5, %v3261_v20 }
0x1694   :  { %v3263_v55 = vmul.f32 %v3262_v21, %v5113_v7 }
0x16f9   :  { %v3099_v33 = vpop.permute.xlu0 %3098 }
0x16fa   :  { %v3101_v19 = vmul.f32 %v3099_v33, %v3095_v25 }
0x16fc   :  { %3103 = vrot.lane.b32.xlu0 %v3101_v19, %s4410_s20 }
0x1702   :  { %v3266_v57 = vpop.permute.xlu1 %3265 }
0x1703   :  { %v3268_v52 = vmul.f32 %v3266_v57, %v3262_v21 }
0x1705   :  { %3270 = vrot.lane.b32.xlu1 %v3268_v52, %s4410_s20 }
0x176e   :  { %v3104_v39 = vpop.permute.xlu0 %3103 }
0x176f   :  { %v3106_v37 = vadd.f32 %v3104_v39, %v3096_v60 }
0x1771   :  { %4330 = vtanh.f32 %v3106_v37 }
0x1777   :  { %v3271_v38 = vpop.permute.xlu1 %3270 }
0x1778   :  { %v3273_v0 = vadd.f32 %v3271_v38, %v3263_v55 }
0x177a   :  { %4332 = vtanh.f32 %v3273_v0 }
0x177e   :  { %v4331_v40 = vpop.eup %4330 }
0x177f   :  { %3109 = vrot.lane.b32.xlu0 %v4331_v40, %s4409_s1 }
0x1787   :  { %v4333_v42 = vpop.eup %4332 }
0x1788   :  { %3276 = vrot.lane.b32.xlu1 %v4333_v42, %s4409_s1 }
0x17f1   :  { %v3110_v24 = vpop.permute.xlu0 %3109 }
0x17f2   :  { %v3112_v50 = vmul.f32 %v3110_v24, %v3095_v25 }
0x17f4   :  { %3281 = vrot.lane.b32.xlu0 %v3112_v50, %s4410_s20 }
0x17fa   :  { %v3277_v51 = vpop.permute.xlu1 %3276 }
0x17fb   :  { %v3279_v22 = vmul.f32 %v3277_v51, %v3262_v21 }
0x17fd   :  { %3356 = vrot.lane.b32.xlu1 %v3279_v22, %s4410_s20 }
0x1866   :  { %v3282_v56 = vpop.permute.xlu0 %3281 }
0x1867   :  { %4210 = vmatmul.mubr.msk.f32.vlgmr.msra.gmra.mxu1 %vm239_vm2, %v3282_v56 }
0x1868   :  { %4231 = vmatprep.mubr.msk.f32.mxu1 %vm4412_vm1, %v4411_v18 }
0x186f   :  { %v3357_v28 = vpop.permute.xlu1 %3356 }
0x1870   :  { %4221 = vmatmul.mubr.msk.f32.vlgmr.msra.gmra.mxu0 %vm239_vm2, %v3357_v28 }
0x1927   :  { %v3351_v59 = vpop.f32.mrf.mxu1 }
0x1928   :  { %v3352_v41 = vadd.f32 %v5096_v31, %v3351_v59  ;;  %v3455_v31 = vld [vmem:[#allocation3 + $0xd8] sm:$0xff] }
0x1929   :  { %v4211_v29 = vpop.f32.mrf.mxu1  ;;  %4224 = vmatpush3.msra.mxu1 %v3455_v31 }
0x192a   :  { %4225 = vmatprep.subr.mxu1 %v4411_v18 }
0x192b   :  { %4226 = vmatpush3.msra.mxu1 %v3454_v4 }
0x192c   :  { %4227 = vmatprep.subr.mxu1 %v4411_v18 }
0x1930   :  { %v3426_v61 = vpop.f32.mrf.mxu0 }
0x1931   :  { %v3430_v27 = vadd.f32 %v3426_v61, %v3352_v41 }
0x1932   :  { %v4222_v62 = vpop.f32.mrf.mxu0 }
0x1933   :  { %v3431_v6 = vmul.f32 %v4909_v58, %v3430_v27  ;;  %v3453_v58 = vld [vmem:[#allocation3 + $0xc8] sm:$0xff] }
0x1934   :  { %4228 = vmatpush3.msra.mxu1 %v3453_v58 }
0x1935   :  { %4334 = vtanh.f32 %v3431_v6  ;;  %4229 = vmatprep.subr.mxu1 %v4411_v18 }
0x1936   :  { %4230 = vmatpush3.msra.mxu1 %v3452_v63 }
0x1942   :  { %v4335_v7 = vpop.eup %4334 }
0x1943   :  { %3437 = vrot.lane.b32.xlu0 %v4335_v7, %s4409_s1  ;;  %v3433_v53 = vmul.f32 0.5, %v4335_v7 }
0x1945   :  { %v3434_v54 = vadd.f32 0.5, %v3433_v53 }
0x1947   :  { %v3435_v14 = vmul.f32 %v3434_v54, %v3273_v0 }
0x19b5   :  { %v3438_v17 = vpop.permute.xlu0 %3437 }
0x19b6   :  { %v3440_v13 = vmul.f32 %v3438_v17, %v3434_v54 }
0x19b8   :  { %3442 = vrot.lane.b32.xlu1 %v3440_v13, %s4410_s20 }
0x1a2a   :  { %v3443_v43 = vpop.permute.xlu1 %3442 }
0x1a2b   :  { %v3445_v36 = vadd.f32 %v3443_v43, %v3435_v14 }
0x1a2d   :  { %4336 = vtanh.f32 %v3445_v36 }
0x1a3a   :  { %v4337_v23 = vpop.eup %4336 }
0x1a3b   :  { %3448 = vrot.lane.b32.xlu0 %v4337_v23, %s4409_s1 }
0x1aad   :  { %v3449_v5 = vpop.permute.xlu0 %3448 }
0x1aae   :  { %v3451_v46 = vmul.f32 %v3449_v5, %v3434_v54 }
0x1ab0   :  { %3462 = vrot.lane.b32.xlu1 %v3451_v46, %s4410_s20 }
0x1b22   :  { %v3463_v47 = vpop.permute.xlu1 %3462 }
0x1b23   :  { %4232 = vmatmul.mubr.msk.f32.vlgmr.msra.gmra.mxu1 %vm239_vm2, %v3463_v47 }
0x1be3   :  { %v3532_v44 = vpop.f32.mrf.mxu1 }
0x1be4   :  { %v3533_v45 = vadd.f32 %v3601_v48, %v3532_v44 }
0x1be5   :  { %v4233_v1 = vpop.f32.mrf.mxu1 }
0x1be6   :  { %3536 = vst [vmem:[#allocation6] sm:$0xff] %v3533_v45 }
0x1be7   :  { %4393 = shalt.err (!%p4390_p9)
}
0x1be8   :  { %3546 = dma.vmem_to_hbm [thread:$0]  %s3544_s5, 128, %s5189_s2, [#allocation5]  }
0x1be9   :  { %4404 = dma.done.wait [#allocation5], 128  }
0x1bea   :  { %4405 = vsyncadd [#allocation5], 4294967168 }
0x1beb   :  { %3550 = vsyncpa [#allocation4], 1 }
0x1bec   :  { %3551 = vsyncpa [#allocation5], 1 }

</bundles_post_ra>
